<compile_context>
chip_gen: v6e
topology: v6e:2x2x1
jax: 0.10.0
libtpu: 0.0.40
codegen_flags: <defaults>
</compile_context>

<pallas_src>
import jax
import jax.numpy as jnp
import numpy as np
from jax.experimental import pallas as pl
from jax.experimental.pallas import tpu as pltpu

# ----------------------------- configuration --------------------------------
FRAME = 16          # 1-D "frame" length (PyTorch default 224, shrunk)
EMBED = 32          # embedding_dim (PyTorch default 768, shrunk)
N_IN = 1            # n_input_channels
KSIZE, STRIDE, PAD = 7, 2, 3            # tokenizer conv
PK, PS, PP = 3, 2, 1                    # tokenizer max-pool
NUM_LAYERS = 2
NUM_HEADS = 2
MLP_RATIO = 2.0
NUM_CLASSES = 10
LN_EPS = 1e-5
OUT_PAD = 128                           # lane-dense classifier width

SEQ_CONV = (FRAME + 2 * PAD - KSIZE) // STRIDE + 1        # after Conv1d
SEQ_POOL = (SEQ_CONV + 2 * PP - PK) // PS + 1             # after MaxPool1d
MLP_HID = int(EMBED * MLP_RATIO)
HEAD_DIM = EMBED // NUM_HEADS

# static im2col gather index (host-side constant, built once at import)
_COL_IDX = np.arange(SEQ_CONV)[:, None] * STRIDE + np.arange(KSIZE)[None, :]


# ----------------------------- kernel helpers --------------------------------
def _layer_norm(x, g, b):
    mu = jnp.mean(x, axis=-1, keepdims=True)
    var = jnp.mean((x - mu) ** 2, axis=-1, keepdims=True)
    return (x - mu) * jax.lax.rsqrt(var + LN_EPS) * g + b


def _softmax_lanes(s):
    s = s - jnp.max(s, axis=-1, keepdims=True)
    p = jnp.exp(s)
    return p * pl.reciprocal(jnp.sum(p, axis=-1, keepdims=True), approx=True)


# ------------------------------- fused kernel --------------------------------
def oct_kernel(patches_ref, wconv_ref, psel_ref, pos_ref, wqkv_ref, wo_ref,
               w1_ref, w2_ref, vecs_ref, hvecs_ref, wfc_ref, o_ref):
    D = EMBED

    # --- tokenizer: Conv1d (no bias) as (Lc, Cin*K) @ (Cin*K, D) + ReLU ------
    conv = jnp.maximum(
        jnp.dot(patches_ref[0], wconv_ref[...],
                preferred_element_type=jnp.float32), 0.0)        # (Lc, D) f32

    # --- MaxPool1d(k=3, s=2, p=1) via 3 precomputed selection matmuls --------
    # out-of-range taps select a zero row; that never wins the max because the
    # conv output is post-ReLU (>= 0, no conv bias).
    t0 = jnp.dot(psel_ref[0], conv, preferred_element_type=jnp.float32)
    t1 = jnp.dot(psel_ref[1], conv, preferred_element_type=jnp.float32)
    t2 = jnp.dot(psel_ref[2], conv, preferred_element_type=jnp.float32)
    x2 = jnp.maximum(jnp.maximum(t0, t1), t2) + pos_ref[...]     # (Sp, D) f32

    # --- transformer encoder stack (eval: dropout / drop-path = identity) ----
    for layer in range(NUM_LAYERS):
        lv = vecs_ref[layer]                                     # (8, MLP_HID)
        ln1g, ln1b = lv[0:1, :D], lv[1:2, :D]
        bo = lv[2:3, :D]
        ln2g, ln2b = lv[3:4, :D], lv[4:5, :D]
        b1 = lv[5:6, :]                                          # (1, MLP_HID)
        b2 = lv[6:7, :D]
        wqkv_l = wqkv_ref[layer]                                 # (D, 3D) bf16
        wo_l = wo_ref[layer]                                     # (D, D)  bf16

        # pre-norm MHSA (qkv bias-less; Q pre-scaled at pack time; proj bias bo)
        h = _layer_norm(x2, ln1g, ln1b)
        qkv = jnp.dot(h.astype(jnp.bfloat16), wqkv_l,
                      preferred_element_type=jnp.float32)        # (Sp, 3D) f32

        attn = None
        for hd in range(NUM_HEADS):
            c0 = hd * HEAD_DIM
            qh = qkv[:, c0:c0 + HEAD_DIM].astype(jnp.bfloat16)
            kh = qkv[:, D + c0:D + c0 + HEAD_DIM].astype(jnp.bfloat16)
            vh = qkv[:, 2 * D + c0:2 * D + c0 + HEAD_DIM].astype(jnp.bfloat16)
            s = jax.lax.dot_general(qh, kh, (((1,), (1,)), ((), ())),
                                    preferred_element_type=jnp.float32)
            p = _softmax_lanes(s)                                # (Sp, Sp) f32
            oh = jnp.dot(p.astype(jnp.bfloat16), vh,
                         preferred_element_type=jnp.float32)
            # concat(o_heads) @ Wo  ==  sum_h  o_h @ Wo[h*dh:(h+1)*dh, :]
            contrib = jnp.dot(oh.astype(jnp.bfloat16),
                              wo_l[c0:c0 + HEAD_DIM, :],
                              preferred_element_type=jnp.float32)
            attn = contrib if attn is None else attn + contrib
        x2 = x2 + attn + bo                                      # residual 1

        # CCT ordering: post-attention LayerNorm, then GELU MLP, residual
        x2 = _layer_norm(x2, ln2g, ln2b)
        hm = jnp.dot(x2.astype(jnp.bfloat16), w1_ref[layer],
                     preferred_element_type=jnp.float32) + b1
        hm = jax.nn.gelu(hm, approximate=True)                   # tanh GELU (EUP)
        x2 = x2 + jnp.dot(hm.astype(jnp.bfloat16), w2_ref[layer],
                          preferred_element_type=jnp.float32) + b2

    # --- final LayerNorm + seq-pool (softmax over S) + classifier fc ----------
    hv = hvecs_ref[...]                                          # (8, 128) f32
    lnfg, lnfb = hv[0:1, :D], hv[1:2, :D]
    wp = hv[2:3, :D]
    bp = hv[3:4, 0:1]
    bfc = hv[4:5, :]                                             # (1, 128)

    xf = _layer_norm(x2, lnfg, lnfb)                             # (Sp, D)
    g = jnp.sum(xf * wp, axis=-1, keepdims=True) + bp            # (Sp, 1)
    g = g - jnp.max(g, axis=0, keepdims=True)
    pw = jnp.exp(g)
    pw = pw * pl.reciprocal(jnp.sum(pw, axis=0, keepdims=True), approx=True)
    pooled = jnp.sum(pw * xf, axis=0, keepdims=True)             # (1, D)

    logits = jnp.dot(pooled.astype(jnp.bfloat16), wfc_ref[...],
                     preferred_element_type=jnp.float32) + bfc   # (1, 128)
    o_ref[...] = logits.reshape(o_ref.shape)


# ------------------------------ host-side glue --------------------------------
def pack_params(params):
    """One-time host-side packing / casting — NOT in the per-call jitted path."""
    scale = HEAD_DIM ** -0.5

    def pad_to(v, w):
        return jnp.pad(v, ((0, 0), (0, w - v.shape[-1])))

    vecs = jnp.stack([
        jnp.concatenate([
            pad_to(l["ln1g"], MLP_HID), pad_to(l["ln1b"], MLP_HID),
            pad_to(l["bo"], MLP_HID), pad_to(l["ln2g"], MLP_HID),
            pad_to(l["ln2b"], MLP_HID), l["b1"],
            pad_to(l["b2"], MLP_HID),
            jnp.zeros((1, MLP_HID), jnp.float32)], axis=0)
        for l in params["layers"]])                              # (L, 8, MLP_HID)

    # fold the attention scale (1/sqrt(head_dim)) into the Q columns of wqkv
    wqkv = jnp.stack([
        jnp.concatenate([l["wqkv"][:, :EMBED] * scale, l["wqkv"][:, EMBED:]],
                        axis=1)
        for l in params["layers"]]).astype(jnp.bfloat16)         # (L, D, 3D)
    wo = jnp.stack([l["wo"] for l in params["layers"]]).astype(jnp.bfloat16)
    w1 = jnp.stack([l["w1"] for l in params["layers"]]).astype(jnp.bfloat16)
    w2 = jnp.stack([l["w2"] for l in params["layers"]]).astype(jnp.bfloat16)

    hvecs = jnp.concatenate([
        pad_to(params["lnfg"], OUT_PAD), pad_to(params["lnfb"], OUT_PAD),
        pad_to(params["wp"].reshape(1, EMBED), OUT_PAD),
        pad_to(params["bp"].reshape(1, 1), OUT_PAD),
        pad_to(params["bfc"], OUT_PAD),
        jnp.zeros((3, OUT_PAD), jnp.float32)], axis=0)           # (8, 128)

    # maxpool(k=3, s=2, p=1) tap-selection matrices (static)
    p_ids = np.arange(SEQ_POOL)[:, None]
    s_ids = np.arange(SEQ_CONV)[None, :]
    psel = jnp.asarray(np.stack(
        [(s_ids == PS * p_ids + off).astype(np.float32)
         for off in (-PP, 1 - PP, 2 - PP)]))                     # (3, Sp, Lc)

    w_conv = params["w_conv"].astype(jnp.bfloat16)               # (Cin*K, D)
    pos = params["pos_emb"].reshape(SEQ_POOL, EMBED)             # (Sp, D) f32
    wfc = pad_to(params["wfc"], OUT_PAD).astype(jnp.bfloat16)    # (D, 128)
    return (w_conv, psel, pos, wqkv, wo, w1, w2, vecs, hvecs, wfc)


@jax.jit
def oct_forward(x, packed):
    (w_conv, psel, pos, wqkv, wo, w1, w2, vecs, hvecs, wfc) = packed
    B = x.shape[0]

    # im2col with a static index table (built once at import time)
    xp = jnp.pad(x, ((0, 0), (0, 0), (PAD, PAD)))
    patches = jnp.transpose(xp[:, :, _COL_IDX], (0, 2, 1, 3)).reshape(
        B, SEQ_CONV, N_IN * KSIZE).astype(jnp.bfloat16)          # (B, Lc, Cin*K)

    def full(shape):
        return lambda b: (0,) * len(shape)

    out = pl.pallas_call(
        oct_kernel,
        grid=(B,),
        in_specs=[
            pl.BlockSpec((1, SEQ_CONV, N_IN * KSIZE), lambda b: (b, 0, 0)),
            pl.BlockSpec(w_conv.shape, full(w_conv.shape)),
            pl.BlockSpec(psel.shape, full(psel.shape)),
            pl.BlockSpec(pos.shape, full(pos.shape)),
            pl.BlockSpec(wqkv.shape, full(wqkv.shape)),
            pl.BlockSpec(wo.shape, full(wo.shape)),
            pl.BlockSpec(w1.shape, full(w1.shape)),
            pl.BlockSpec(w2.shape, full(w2.shape)),
            pl.BlockSpec(vecs.shape, full(vecs.shape)),
            pl.BlockSpec(hvecs.shape, full(hvecs.shape)),
            pl.BlockSpec(wfc.shape, full(wfc.shape)),
        ],
        out_specs=pl.BlockSpec((1, 1, OUT_PAD), lambda b: (b, 0, 0)),
        out_shape=jax.ShapeDtypeStruct((B, 1, OUT_PAD), jnp.float32),
        compiler_params=pltpu.CompilerParams(
            dimension_semantics=("parallel",)),   # v7x: batch split over 2 TCs
    )(patches, w_conv, psel, pos, wqkv, wo, w1, w2, vecs, hvecs, wfc)
    return out[:, 0, :NUM_CLASSES]


# ------------------------------ pure-JAX reference ---------------------------
def ref_forward(x, params):
    hp = jax.lax.Precision.HIGHEST
    B = x.shape[0]
    D = EMBED
    xp = jnp.pad(x, ((0, 0), (0, 0), (PAD, PAD)))
    idx = jnp.arange(SEQ_CONV)[:, None] * STRIDE + jnp.arange(KSIZE)[None, :]
    patches = jnp.transpose(xp[:, :, idx], (0, 2, 1, 3)).reshape(
        B, SEQ_CONV, N_IN * KSIZE)
    conv = jnp.maximum(
        jnp.einsum("blk,kd->bld", patches, params["w_conv"], precision=hp), 0.0)
    neg = jnp.full((B, PP, D), -jnp.inf)
    cpad = jnp.concatenate([neg, conv, neg], axis=1)
    pooled = jnp.maximum(jnp.maximum(cpad[:, 0:PS * SEQ_POOL:PS],
                                     cpad[:, 1:1 + PS * SEQ_POOL:PS]),
                         cpad[:, 2:2 + PS * SEQ_POOL:PS])
    xx = pooled + params["pos_emb"]

    def ln(v, g, b):
        mu = jnp.mean(v, -1, keepdims=True)
        var = jnp.mean((v - mu) ** 2, -1, keepdims=True)
        return (v - mu) / jnp.sqrt(var + LN_EPS) * g + b

    dh = D // NUM_HEADS
    for lyr in params["layers"]:
        h = ln(xx, lyr["ln1g"], lyr["ln1b"])
        qkv = jnp.einsum("bsd,de->bse", h, lyr["wqkv"], precision=hp)
        q, k, v = qkv[..., :D], qkv[..., D:2 * D], qkv[..., 2 * D:]
        outs = []
        for hd in range(NUM_HEADS):
            sl = slice(hd * dh, (hd + 1) * dh)
            s = jnp.einsum("bqd,bkd->bqk", q[..., sl], k[..., sl],
                           precision=hp) * (dh ** -0.5)
            p = jax.nn.softmax(s, axis=-1)
            outs.append(jnp.einsum("bqk,bkd->bqd", p, v[..., sl], precision=hp))
        attn = jnp.einsum("bsd,de->bse", jnp.concatenate(outs, -1),
                          lyr["wo"], precision=hp) + lyr["bo"]
        xx = xx + attn
        xx = ln(xx, lyr["ln2g"], lyr["ln2b"])
        hm = jax.nn.gelu(jnp.einsum("bsd,dh->bsh", xx, lyr["w1"], precision=hp)
                         + lyr["b1"], approximate=False)
        xx = xx + jnp.einsum("bsh,hd->bsd", hm, lyr["w2"], precision=hp) + lyr["b2"]
    xx = ln(xx, params["lnfg"], params["lnfb"])
    g = jnp.sum(xx * params["wp"], -1, keepdims=True) + params["bp"]
    p = jax.nn.softmax(g, axis=1)
    pooled2 = jnp.sum(p * xx, axis=1)
    return jnp.einsum("bd,dc->bc", pooled2, params["wfc"],
                      precision=hp) + params["bfc"]


# ------------------------------ parameters -----------------------------------
def init_params(key):
    keys = iter(jax.random.split(key, 32))

    def nrm(shape, std=0.02):
        return jax.random.normal(next(keys), shape, jnp.float32) * std

    params = {
        "w_conv": nrm((N_IN * KSIZE, EMBED), 0.1),          # Conv1d weight (no bias)
        "pos_emb": nrm((1, SEQ_POOL, EMBED), 0.2),          # learnable positional emb
        "layers": [],
        "lnfg": jnp.ones((1, EMBED), jnp.float32),
        "lnfb": jnp.zeros((1, EMBED), jnp.float32),
        "wp": nrm((1, 1, EMBED), 0.02),                     # attention_pool: D -> 1
        "bp": jnp.zeros((1, 1, 1), jnp.float32),
        "wfc": nrm((EMBED, NUM_CLASSES), 0.02),             # classifier fc
        "bfc": jnp.zeros((1, NUM_CLASSES), jnp.float32),
    }
    for _ in range(NUM_LAYERS):
        params["layers"].append({
            "ln1g": jnp.ones((1, EMBED), jnp.float32),
            "ln1b": jnp.zeros((1, EMBED), jnp.float32),
            "wqkv": nrm((EMBED, 3 * EMBED), 0.02),          # qkv (bias=False)
            "wo": nrm((EMBED, EMBED), 0.02),
            "bo": jnp.zeros((1, EMBED), jnp.float32),
            "ln2g": jnp.ones((1, EMBED), jnp.float32),
            "ln2b": jnp.zeros((1, EMBED), jnp.float32),
            "w1": nrm((EMBED, MLP_HID), 0.02),
            "b1": jnp.zeros((1, MLP_HID), jnp.float32),
            "w2": nrm((MLP_HID, EMBED), 0.02),
            "b2": jnp.zeros((1, EMBED), jnp.float32),
        })
    return params


# TODO(synk): Dropout / DropPath (stochastic depth) are training-only noise ops;
# they are identity in eval mode and therefore omitted from the kernel.

if __name__ == "__main__":
    key = jax.random.PRNGKey(0)
    pkey, xkey = jax.random.split(key)
    params = init_params(pkey)
    packed = pack_params(params)        # one-time packing, outside the jit path
    x = jax.random.normal(xkey, (2, N_IN, FRAME), jnp.float32)  # (B, C_in, frame)

    logits = jax.block_until_ready(oct_forward(x, packed))
    ref = ref_forward(x, params)
    assert logits.shape == (2, NUM_CLASSES)
    np.testing.assert_allclose(np.asarray(logits), np.asarray(ref),
                               rtol=5e-2, atol=5e-2)
    print("KERNEL_OK")
</pallas_src>

<mosaic_0001>
module attributes {stable_mosaic.version = 11 : i64} {
  func.func @oct_kernel(%arg0: i32, %arg1: memref<1x8x7xbf16, #tpu.memory_space<vmem>>, %arg2: memref<7x32xbf16, #tpu.memory_space<vmem>>, %arg3: memref<3x4x8xf32, #tpu.memory_space<vmem>>, %arg4: memref<4x32xf32, #tpu.memory_space<vmem>>, %arg5: memref<2x32x96xbf16, #tpu.memory_space<vmem>>, %arg6: memref<2x32x32xbf16, #tpu.memory_space<vmem>>, %arg7: memref<2x32x64xbf16, #tpu.memory_space<vmem>>, %arg8: memref<2x64x32xbf16, #tpu.memory_space<vmem>>, %arg9: memref<2x8x64xf32, #tpu.memory_space<vmem>>, %arg10: memref<8x128xf32, #tpu.memory_space<vmem>>, %arg11: memref<32x128xbf16, #tpu.memory_space<vmem>>, %arg12: memref<1x1x128xf32, #tpu.memory_space<vmem>>) attributes {dimension_semantics = [#tpu.dimension_semantics<parallel>], iteration_bounds = array<i64: 2>, scalar_prefetch = 0 : i64, scratch_operands = 0 : i64, tpu.core_type = #tpu.core_type<tc>, window_params = [{transform_indices = @transform_0, window_bounds = array<i64: 1, 8, 7>}, {pipeline_mode = #tpu.pipeline_mode<synchronous>, transform_indices = @transform_1, window_bounds = array<i64: 7, 32>}, {pipeline_mode = #tpu.pipeline_mode<synchronous>, transform_indices = @transform_2, window_bounds = array<i64: 3, 4, 8>}, {pipeline_mode = #tpu.pipeline_mode<synchronous>, transform_indices = @transform_3, window_bounds = array<i64: 4, 32>}, {pipeline_mode = #tpu.pipeline_mode<synchronous>, transform_indices = @transform_4, window_bounds = array<i64: 2, 32, 96>}, {pipeline_mode = #tpu.pipeline_mode<synchronous>, transform_indices = @transform_5, window_bounds = array<i64: 2, 32, 32>}, {pipeline_mode = #tpu.pipeline_mode<synchronous>, transform_indices = @transform_6, window_bounds = array<i64: 2, 32, 64>}, {pipeline_mode = #tpu.pipeline_mode<synchronous>, transform_indices = @transform_7, window_bounds = array<i64: 2, 64, 32>}, {pipeline_mode = #tpu.pipeline_mode<synchronous>, transform_indices = @transform_8, window_bounds = array<i64: 2, 8, 64>}, {pipeline_mode = #tpu.pipeline_mode<synchronous>, transform_indices = @transform_9, window_bounds = array<i64: 8, 128>}, {pipeline_mode = #tpu.pipeline_mode<synchronous>, transform_indices = @transform_10, window_bounds = array<i64: 32, 128>}, {transform_indices = @transform_11, window_bounds = array<i64: 1, 1, 128>}]} {
    %c0 = arith.constant 0 : index
    %c0_0 = arith.constant 0 : index
    %c0_1 = arith.constant 0 : index
    %0 = vector.load %arg1[%c0, %c0_0, %c0_1] : memref<1x8x7xbf16, #tpu.memory_space<vmem>>, vector<1x8x7xbf16>
    %1 = vector.shape_cast %0 : vector<1x8x7xbf16> to vector<8x7xbf16>
    %c0_2 = arith.constant 0 : index
    %c0_3 = arith.constant 0 : index
    %2 = vector.load %arg2[%c0_2, %c0_3] : memref<7x32xbf16, #tpu.memory_space<vmem>>, vector<7x32xbf16>
    %cst = arith.constant dense<0.000000e+00> : vector<8x32xf32>
    %3 = tpu.matmul %1, %2, %cst {dimension_numbers = #tpu.dot_dimension_numbers<[1], [0], [0], [1], [0, 0, 1, 1], [], []>} : vector<8x7xbf16>, vector<7x32xbf16>, vector<8x32xf32> -> vector<8x32xf32>
    %cst_4 = arith.constant 0.000000e+00 : f32
    %4 = vector.broadcast %cst_4 : f32 to vector<8x32xf32>
    %5 = arith.maximumf %3, %4 : vector<8x32xf32>
    %c0_5 = arith.constant 0 : index
    %c0_6 = arith.constant 0 : index
    %c0_7 = arith.constant 0 : index
    %6 = vector.load %arg3[%c0_5, %c0_6, %c0_7] : memref<3x4x8xf32, #tpu.memory_space<vmem>>, vector<1x4x8xf32>
    %7 = vector.shape_cast %6 : vector<1x4x8xf32> to vector<4x8xf32>
    %cst_8 = arith.constant dense<0.000000e+00> : vector<4x32xf32>
    %8 = tpu.matmul %7, %5, %cst_8 {dimension_numbers = #tpu.dot_dimension_numbers<[1], [0], [0], [1], [0, 0, 1, 1], [], []>} : vector<4x8xf32>, vector<8x32xf32>, vector<4x32xf32> -> vector<4x32xf32>
    %c1 = arith.constant 1 : index
    %c0_9 = arith.constant 0 : index
    %c0_10 = arith.constant 0 : index
    %9 = vector.load %arg3[%c1, %c0_9, %c0_10] : memref<3x4x8xf32, #tpu.memory_space<vmem>>, vector<1x4x8xf32>
    %10 = vector.shape_cast %9 : vector<1x4x8xf32> to vector<4x8xf32>
    %cst_11 = arith.constant dense<0.000000e+00> : vector<4x32xf32>
    %11 = tpu.matmul %10, %5, %cst_11 {dimension_numbers = #tpu.dot_dimension_numbers<[1], [0], [0], [1], [0, 0, 1, 1], [], []>} : vector<4x8xf32>, vector<8x32xf32>, vector<4x32xf32> -> vector<4x32xf32>
    %c2 = arith.constant 2 : index
    %c0_12 = arith.constant 0 : index
    %c0_13 = arith.constant 0 : index
    %12 = vector.load %arg3[%c2, %c0_12, %c0_13] : memref<3x4x8xf32, #tpu.memory_space<vmem>>, vector<1x4x8xf32>
    %13 = vector.shape_cast %12 : vector<1x4x8xf32> to vector<4x8xf32>
    %cst_14 = arith.constant dense<0.000000e+00> : vector<4x32xf32>
    %14 = tpu.matmul %13, %5, %cst_14 {dimension_numbers = #tpu.dot_dimension_numbers<[1], [0], [0], [1], [0, 0, 1, 1], [], []>} : vector<4x8xf32>, vector<8x32xf32>, vector<4x32xf32> -> vector<4x32xf32>
    %15 = arith.maximumf %8, %11 : vector<4x32xf32>
    %16 = arith.maximumf %15, %14 : vector<4x32xf32>
    %c0_15 = arith.constant 0 : index
    %c0_16 = arith.constant 0 : index
    %17 = vector.load %arg4[%c0_15, %c0_16] : memref<4x32xf32, #tpu.memory_space<vmem>>, vector<4x32xf32>
    %18 = arith.addf %16, %17 : vector<4x32xf32>
    %c0_17 = arith.constant 0 : index
    %c0_18 = arith.constant 0 : index
    %c0_19 = arith.constant 0 : index
    %19 = vector.load %arg9[%c0_17, %c0_18, %c0_19] : memref<2x8x64xf32, #tpu.memory_space<vmem>>, vector<1x8x64xf32>
    %20 = vector.shape_cast %19 : vector<1x8x64xf32> to vector<8x64xf32>
    %21 = vector.extract_strided_slice %20 {offsets = [0, 0], sizes = [1, 32], strides = [1, 1]} : vector<8x64xf32> to vector<1x32xf32>
    %22 = vector.extract_strided_slice %20 {offsets = [1, 0], sizes = [1, 32], strides = [1, 1]} : vector<8x64xf32> to vector<1x32xf32>
    %23 = vector.extract_strided_slice %20 {offsets = [2, 0], sizes = [1, 32], strides = [1, 1]} : vector<8x64xf32> to vector<1x32xf32>
    %24 = vector.extract_strided_slice %20 {offsets = [3, 0], sizes = [1, 32], strides = [1, 1]} : vector<8x64xf32> to vector<1x32xf32>
    %25 = vector.extract_strided_slice %20 {offsets = [4, 0], sizes = [1, 32], strides = [1, 1]} : vector<8x64xf32> to vector<1x32xf32>
    %26 = vector.extract_strided_slice %20 {offsets = [5, 0], sizes = [1, 64], strides = [1, 1]} : vector<8x64xf32> to vector<1x64xf32>
    %27 = vector.extract_strided_slice %20 {offsets = [6, 0], sizes = [1, 32], strides = [1, 1]} : vector<8x64xf32> to vector<1x32xf32>
    %c0_20 = arith.constant 0 : index
    %c0_21 = arith.constant 0 : index
    %c0_22 = arith.constant 0 : index
    %28 = vector.load %arg5[%c0_20, %c0_21, %c0_22] : memref<2x32x96xbf16, #tpu.memory_space<vmem>>, vector<1x32x96xbf16>
    %29 = vector.shape_cast %28 : vector<1x32x96xbf16> to vector<32x96xbf16>
    %c0_23 = arith.constant 0 : index
    %c0_24 = arith.constant 0 : index
    %c0_25 = arith.constant 0 : index
    %30 = vector.load %arg6[%c0_23, %c0_24, %c0_25] : memref<2x32x32xbf16, #tpu.memory_space<vmem>>, vector<1x32x32xbf16>
    %31 = vector.shape_cast %30 : vector<1x32x32xbf16> to vector<32x32xbf16>
    %cst_26 = arith.constant dense<0.000000e+00> : vector<4xf32>
    %32 = vector.multi_reduction <add>, %18, %cst_26 [1] : vector<4x32xf32> to vector<4xf32>
    %33 = vector.shape_cast %32 : vector<4xf32> to vector<4x1xf32>
    %cst_27 = arith.constant 3.200000e+01 : f32
    %34 = vector.broadcast %cst_27 : f32 to vector<4x1xf32>
    %35 = arith.divf %33, %34 : vector<4x1xf32>
    %36 = vector.broadcast %35 : vector<4x1xf32> to vector<4x32xf32>
    %37 = arith.subf %18, %36 : vector<4x32xf32>
    %38 = arith.mulf %37, %37 : vector<4x32xf32>
    %cst_28 = arith.constant dense<0.000000e+00> : vector<4xf32>
    %39 = vector.multi_reduction <add>, %38, %cst_28 [1] : vector<4x32xf32> to vector<4xf32>
    %40 = vector.shape_cast %39 : vector<4xf32> to vector<4x1xf32>
    %cst_29 = arith.constant 3.200000e+01 : f32
    %41 = vector.broadcast %cst_29 : f32 to vector<4x1xf32>
    %42 = arith.divf %40, %41 : vector<4x1xf32>
    %43 = vector.broadcast %35 : vector<4x1xf32> to vector<4x32xf32>
    %44 = arith.subf %18, %43 : vector<4x32xf32>
    %cst_30 = arith.constant 9.99999974E-6 : f32
    %45 = vector.broadcast %cst_30 : f32 to vector<4x1xf32>
    %46 = arith.addf %42, %45 : vector<4x1xf32>
    %47 = math.rsqrt %46 : vector<4x1xf32>
    %48 = vector.broadcast %47 : vector<4x1xf32> to vector<4x32xf32>
    %49 = arith.mulf %44, %48 : vector<4x32xf32>
    %50 = vector.broadcast %21 : vector<1x32xf32> to vector<4x32xf32>
    %51 = arith.mulf %49, %50 : vector<4x32xf32>
    %52 = vector.broadcast %22 : vector<1x32xf32> to vector<4x32xf32>
    %53 = arith.addf %51, %52 : vector<4x32xf32>
    %54 = arith.truncf %53 : vector<4x32xf32> to vector<4x32xbf16>
    %cst_31 = arith.constant dense<0.000000e+00> : vector<4x96xf32>
    %55 = tpu.matmul %54, %29, %cst_31 {dimension_numbers = #tpu.dot_dimension_numbers<[1], [0], [0], [1], [0, 0, 1, 1], [], []>} : vector<4x32xbf16>, vector<32x96xbf16>, vector<4x96xf32> -> vector<4x96xf32>
    %56 = vector.extract_strided_slice %55 {offsets = [0, 0], sizes = [4, 16], strides = [1, 1]} : vector<4x96xf32> to vector<4x16xf32>
    %57 = arith.truncf %56 : vector<4x16xf32> to vector<4x16xbf16>
    %58 = vector.extract_strided_slice %55 {offsets = [0, 32], sizes = [4, 16], strides = [1, 1]} : vector<4x96xf32> to vector<4x16xf32>
    %59 = arith.truncf %58 : vector<4x16xf32> to vector<4x16xbf16>
    %60 = vector.extract_strided_slice %55 {offsets = [0, 64], sizes = [4, 16], strides = [1, 1]} : vector<4x96xf32> to vector<4x16xf32>
    %61 = arith.truncf %60 : vector<4x16xf32> to vector<4x16xbf16>
    %cst_32 = arith.constant dense<0.000000e+00> : vector<4x4xf32>
    %62 = tpu.matmul %57, %59, %cst_32 {dimension_numbers = #tpu.dot_dimension_numbers<[1], [1], [0], [0], [0, 0, 1, 0], [], []>} : vector<4x16xbf16>, vector<4x16xbf16>, vector<4x4xf32> -> vector<4x4xf32>
    %cst_33 = arith.constant dense<0xFF800000> : vector<4xf32>
    %63 = vector.multi_reduction <maximumf>, %62, %cst_33 [1] : vector<4x4xf32> to vector<4xf32>
    %64 = vector.shape_cast %63 : vector<4xf32> to vector<4x1xf32>
    %65 = vector.broadcast %64 : vector<4x1xf32> to vector<4x4xf32>
    %66 = arith.subf %62, %65 : vector<4x4xf32>
    %67 = math.exp %66 : vector<4x4xf32>
    %cst_34 = arith.constant dense<0.000000e+00> : vector<4xf32>
    %68 = vector.multi_reduction <add>, %67, %cst_34 [1] : vector<4x4xf32> to vector<4xf32>
    %69 = vector.shape_cast %68 : vector<4xf32> to vector<4x1xf32>
    %70 = tpu.reciprocal %69 {approx = true} : vector<4x1xf32> -> vector<4x1xf32>
    %71 = vector.broadcast %70 : vector<4x1xf32> to vector<4x4xf32>
    %72 = arith.mulf %67, %71 : vector<4x4xf32>
    %73 = arith.truncf %72 : vector<4x4xf32> to vector<4x4xbf16>
    %cst_35 = arith.constant dense<0.000000e+00> : vector<4x16xf32>
    %74 = tpu.matmul %73, %61, %cst_35 {dimension_numbers = #tpu.dot_dimension_numbers<[1], [0], [0], [1], [0, 0, 1, 1], [], []>} : vector<4x4xbf16>, vector<4x16xbf16>, vector<4x16xf32> -> vector<4x16xf32>
    %75 = arith.truncf %74 : vector<4x16xf32> to vector<4x16xbf16>
    %76 = vector.extract_strided_slice %31 {offsets = [0, 0], sizes = [16, 32], strides = [1, 1]} : vector<32x32xbf16> to vector<16x32xbf16>
    %cst_36 = arith.constant dense<0.000000e+00> : vector<4x32xf32>
    %77 = tpu.matmul %75, %76, %cst_36 {dimension_numbers = #tpu.dot_dimension_numbers<[1], [0], [0], [1], [0, 0, 1, 1], [], []>} : vector<4x16xbf16>, vector<16x32xbf16>, vector<4x32xf32> -> vector<4x32xf32>
    %78 = vector.extract_strided_slice %55 {offsets = [0, 16], sizes = [4, 16], strides = [1, 1]} : vector<4x96xf32> to vector<4x16xf32>
    %79 = arith.truncf %78 : vector<4x16xf32> to vector<4x16xbf16>
    %80 = vector.extract_strided_slice %55 {offsets = [0, 48], sizes = [4, 16], strides = [1, 1]} : vector<4x96xf32> to vector<4x16xf32>
    %81 = arith.truncf %80 : vector<4x16xf32> to vector<4x16xbf16>
    %82 = vector.extract_strided_slice %55 {offsets = [0, 80], sizes = [4, 16], strides = [1, 1]} : vector<4x96xf32> to vector<4x16xf32>
    %83 = arith.truncf %82 : vector<4x16xf32> to vector<4x16xbf16>
    %cst_37 = arith.constant dense<0.000000e+00> : vector<4x4xf32>
    %84 = tpu.matmul %79, %81, %cst_37 {dimension_numbers = #tpu.dot_dimension_numbers<[1], [1], [0], [0], [0, 0, 1, 0], [], []>} : vector<4x16xbf16>, vector<4x16xbf16>, vector<4x4xf32> -> vector<4x4xf32>
    %cst_38 = arith.constant dense<0xFF800000> : vector<4xf32>
    %85 = vector.multi_reduction <maximumf>, %84, %cst_38 [1] : vector<4x4xf32> to vector<4xf32>
    %86 = vector.shape_cast %85 : vector<4xf32> to vector<4x1xf32>
    %87 = vector.broadcast %86 : vector<4x1xf32> to vector<4x4xf32>
    %88 = arith.subf %84, %87 : vector<4x4xf32>
    %89 = math.exp %88 : vector<4x4xf32>
    %cst_39 = arith.constant dense<0.000000e+00> : vector<4xf32>
    %90 = vector.multi_reduction <add>, %89, %cst_39 [1] : vector<4x4xf32> to vector<4xf32>
    %91 = vector.shape_cast %90 : vector<4xf32> to vector<4x1xf32>
    %92 = tpu.reciprocal %91 {approx = true} : vector<4x1xf32> -> vector<4x1xf32>
    %93 = vector.broadcast %92 : vector<4x1xf32> to vector<4x4xf32>
    %94 = arith.mulf %89, %93 : vector<4x4xf32>
    %95 = arith.truncf %94 : vector<4x4xf32> to vector<4x4xbf16>
    %cst_40 = arith.constant dense<0.000000e+00> : vector<4x16xf32>
    %96 = tpu.matmul %95, %83, %cst_40 {dimension_numbers = #tpu.dot_dimension_numbers<[1], [0], [0], [1], [0, 0, 1, 1], [], []>} : vector<4x4xbf16>, vector<4x16xbf16>, vector<4x16xf32> -> vector<4x16xf32>
    %97 = arith.truncf %96 : vector<4x16xf32> to vector<4x16xbf16>
    %98 = vector.extract_strided_slice %31 {offsets = [16, 0], sizes = [16, 32], strides = [1, 1]} : vector<32x32xbf16> to vector<16x32xbf16>
    %cst_41 = arith.constant dense<0.000000e+00> : vector<4x32xf32>
    %99 = tpu.matmul %97, %98, %cst_41 {dimension_numbers = #tpu.dot_dimension_numbers<[1], [0], [0], [1], [0, 0, 1, 1], [], []>} : vector<4x16xbf16>, vector<16x32xbf16>, vector<4x32xf32> -> vector<4x32xf32>
    %100 = arith.addf %77, %99 : vector<4x32xf32>
    %101 = arith.addf %18, %100 : vector<4x32xf32>
    %102 = vector.broadcast %23 : vector<1x32xf32> to vector<4x32xf32>
    %103 = arith.addf %101, %102 : vector<4x32xf32>
    %cst_42 = arith.constant dense<0.000000e+00> : vector<4xf32>
    %104 = vector.multi_reduction <add>, %103, %cst_42 [1] : vector<4x32xf32> to vector<4xf32>
    %105 = vector.shape_cast %104 : vector<4xf32> to vector<4x1xf32>
    %cst_43 = arith.constant 3.200000e+01 : f32
    %106 = vector.broadcast %cst_43 : f32 to vector<4x1xf32>
    %107 = arith.divf %105, %106 : vector<4x1xf32>
    %108 = vector.broadcast %107 : vector<4x1xf32> to vector<4x32xf32>
    %109 = arith.subf %103, %108 : vector<4x32xf32>
    %110 = arith.mulf %109, %109 : vector<4x32xf32>
    %cst_44 = arith.constant dense<0.000000e+00> : vector<4xf32>
    %111 = vector.multi_reduction <add>, %110, %cst_44 [1] : vector<4x32xf32> to vector<4xf32>
    %112 = vector.shape_cast %111 : vector<4xf32> to vector<4x1xf32>
    %cst_45 = arith.constant 3.200000e+01 : f32
    %113 = vector.broadcast %cst_45 : f32 to vector<4x1xf32>
    %114 = arith.divf %112, %113 : vector<4x1xf32>
    %115 = vector.broadcast %107 : vector<4x1xf32> to vector<4x32xf32>
    %116 = arith.subf %103, %115 : vector<4x32xf32>
    %cst_46 = arith.constant 9.99999974E-6 : f32
    %117 = vector.broadcast %cst_46 : f32 to vector<4x1xf32>
    %118 = arith.addf %114, %117 : vector<4x1xf32>
    %119 = math.rsqrt %118 : vector<4x1xf32>
    %120 = vector.broadcast %119 : vector<4x1xf32> to vector<4x32xf32>
    %121 = arith.mulf %116, %120 : vector<4x32xf32>
    %122 = vector.broadcast %24 : vector<1x32xf32> to vector<4x32xf32>
    %123 = arith.mulf %121, %122 : vector<4x32xf32>
    %124 = vector.broadcast %25 : vector<1x32xf32> to vector<4x32xf32>
    %125 = arith.addf %123, %124 : vector<4x32xf32>
    %126 = arith.truncf %125 : vector<4x32xf32> to vector<4x32xbf16>
    %c0_47 = arith.constant 0 : index
    %c0_48 = arith.constant 0 : index
    %c0_49 = arith.constant 0 : index
    %127 = vector.load %arg7[%c0_47, %c0_48, %c0_49] : memref<2x32x64xbf16, #tpu.memory_space<vmem>>, vector<1x32x64xbf16>
    %128 = vector.shape_cast %127 : vector<1x32x64xbf16> to vector<32x64xbf16>
    %cst_50 = arith.constant dense<0.000000e+00> : vector<4x64xf32>
    %129 = tpu.matmul %126, %128, %cst_50 {dimension_numbers = #tpu.dot_dimension_numbers<[1], [0], [0], [1], [0, 0, 1, 1], [], []>} : vector<4x32xbf16>, vector<32x64xbf16>, vector<4x64xf32> -> vector<4x64xf32>
    %130 = vector.broadcast %26 : vector<1x64xf32> to vector<4x64xf32>
    %131 = arith.addf %129, %130 : vector<4x64xf32>
    %132 = arith.mulf %131, %131 : vector<4x64xf32>
    %133 = arith.mulf %131, %132 : vector<4x64xf32>
    %cst_51 = arith.constant 4.471500e-02 : f32
    %134 = vector.broadcast %cst_51 : f32 to vector<4x64xf32>
    %135 = arith.mulf %134, %133 : vector<4x64xf32>
    %136 = arith.addf %131, %135 : vector<4x64xf32>
    %cst_52 = arith.constant 0.797884583 : f32
    %137 = vector.broadcast %cst_52 : f32 to vector<4x64xf32>
    %138 = arith.mulf %137, %136 : vector<4x64xf32>
    %139 = math.tanh %138 : vector<4x64xf32>
    %cst_53 = arith.constant 1.000000e+00 : f32
    %140 = vector.broadcast %cst_53 : f32 to vector<4x64xf32>
    %141 = arith.addf %140, %139 : vector<4x64xf32>
    %cst_54 = arith.constant 5.000000e-01 : f32
    %142 = vector.broadcast %cst_54 : f32 to vector<4x64xf32>
    %143 = arith.mulf %142, %141 : vector<4x64xf32>
    %144 = arith.mulf %131, %143 : vector<4x64xf32>
    %145 = arith.truncf %144 : vector<4x64xf32> to vector<4x64xbf16>
    %c0_55 = arith.constant 0 : index
    %c0_56 = arith.constant 0 : index
    %c0_57 = arith.constant 0 : index
    %146 = vector.load %arg8[%c0_55, %c0_56, %c0_57] : memref<2x64x32xbf16, #tpu.memory_space<vmem>>, vector<1x64x32xbf16>
    %147 = vector.shape_cast %146 : vector<1x64x32xbf16> to vector<64x32xbf16>
    %cst_58 = arith.constant dense<0.000000e+00> : vector<4x32xf32>
    %148 = tpu.matmul %145, %147, %cst_58 {dimension_numbers = #tpu.dot_dimension_numbers<[1], [0], [0], [1], [0, 0, 1, 1], [], []>} : vector<4x64xbf16>, vector<64x32xbf16>, vector<4x32xf32> -> vector<4x32xf32>
    %149 = arith.addf %125, %148 : vector<4x32xf32>
    %150 = vector.broadcast %27 : vector<1x32xf32> to vector<4x32xf32>
    %151 = arith.addf %149, %150 : vector<4x32xf32>
    %c1_59 = arith.constant 1 : index
    %c0_60 = arith.constant 0 : index
    %c0_61 = arith.constant 0 : index
    %152 = vector.load %arg9[%c1_59, %c0_60, %c0_61] : memref<2x8x64xf32, #tpu.memory_space<vmem>>, vector<1x8x64xf32>
    %153 = vector.shape_cast %152 : vector<1x8x64xf32> to vector<8x64xf32>
    %154 = vector.extract_strided_slice %153 {offsets = [0, 0], sizes = [1, 32], strides = [1, 1]} : vector<8x64xf32> to vector<1x32xf32>
    %155 = vector.extract_strided_slice %153 {offsets = [1, 0], sizes = [1, 32], strides = [1, 1]} : vector<8x64xf32> to vector<1x32xf32>
    %156 = vector.extract_strided_slice %153 {offsets = [2, 0], sizes = [1, 32], strides = [1, 1]} : vector<8x64xf32> to vector<1x32xf32>
    %157 = vector.extract_strided_slice %153 {offsets = [3, 0], sizes = [1, 32], strides = [1, 1]} : vector<8x64xf32> to vector<1x32xf32>
    %158 = vector.extract_strided_slice %153 {offsets = [4, 0], sizes = [1, 32], strides = [1, 1]} : vector<8x64xf32> to vector<1x32xf32>
    %159 = vector.extract_strided_slice %153 {offsets = [5, 0], sizes = [1, 64], strides = [1, 1]} : vector<8x64xf32> to vector<1x64xf32>
    %160 = vector.extract_strided_slice %153 {offsets = [6, 0], sizes = [1, 32], strides = [1, 1]} : vector<8x64xf32> to vector<1x32xf32>
    %c1_62 = arith.constant 1 : index
    %c0_63 = arith.constant 0 : index
    %c0_64 = arith.constant 0 : index
    %161 = vector.load %arg5[%c1_62, %c0_63, %c0_64] : memref<2x32x96xbf16, #tpu.memory_space<vmem>>, vector<1x32x96xbf16>
    %162 = vector.shape_cast %161 : vector<1x32x96xbf16> to vector<32x96xbf16>
    %c1_65 = arith.constant 1 : index
    %c0_66 = arith.constant 0 : index
    %c0_67 = arith.constant 0 : index
    %163 = vector.load %arg6[%c1_65, %c0_66, %c0_67] : memref<2x32x32xbf16, #tpu.memory_space<vmem>>, vector<1x32x32xbf16>
    %164 = vector.shape_cast %163 : vector<1x32x32xbf16> to vector<32x32xbf16>
    %cst_68 = arith.constant dense<0.000000e+00> : vector<4xf32>
    %165 = vector.multi_reduction <add>, %151, %cst_68 [1] : vector<4x32xf32> to vector<4xf32>
    %166 = vector.shape_cast %165 : vector<4xf32> to vector<4x1xf32>
    %cst_69 = arith.constant 3.200000e+01 : f32
    %167 = vector.broadcast %cst_69 : f32 to vector<4x1xf32>
    %168 = arith.divf %166, %167 : vector<4x1xf32>
    %169 = vector.broadcast %168 : vector<4x1xf32> to vector<4x32xf32>
    %170 = arith.subf %151, %169 : vector<4x32xf32>
    %171 = arith.mulf %170, %170 : vector<4x32xf32>
    %cst_70 = arith.constant dense<0.000000e+00> : vector<4xf32>
    %172 = vector.multi_reduction <add>, %171, %cst_70 [1] : vector<4x32xf32> to vector<4xf32>
    %173 = vector.shape_cast %172 : vector<4xf32> to vector<4x1xf32>
    %cst_71 = arith.constant 3.200000e+01 : f32
    %174 = vector.broadcast %cst_71 : f32 to vector<4x1xf32>
    %175 = arith.divf %173, %174 : vector<4x1xf32>
    %176 = vector.broadcast %168 : vector<4x1xf32> to vector<4x32xf32>
    %177 = arith.subf %151, %176 : vector<4x32xf32>
    %cst_72 = arith.constant 9.99999974E-6 : f32
    %178 = vector.broadcast %cst_72 : f32 to vector<4x1xf32>
    %179 = arith.addf %175, %178 : vector<4x1xf32>
    %180 = math.rsqrt %179 : vector<4x1xf32>
    %181 = vector.broadcast %180 : vector<4x1xf32> to vector<4x32xf32>
    %182 = arith.mulf %177, %181 : vector<4x32xf32>
    %183 = vector.broadcast %154 : vector<1x32xf32> to vector<4x32xf32>
    %184 = arith.mulf %182, %183 : vector<4x32xf32>
    %185 = vector.broadcast %155 : vector<1x32xf32> to vector<4x32xf32>
    %186 = arith.addf %184, %185 : vector<4x32xf32>
    %187 = arith.truncf %186 : vector<4x32xf32> to vector<4x32xbf16>
    %cst_73 = arith.constant dense<0.000000e+00> : vector<4x96xf32>
    %188 = tpu.matmul %187, %162, %cst_73 {dimension_numbers = #tpu.dot_dimension_numbers<[1], [0], [0], [1], [0, 0, 1, 1], [], []>} : vector<4x32xbf16>, vector<32x96xbf16>, vector<4x96xf32> -> vector<4x96xf32>
    %189 = vector.extract_strided_slice %188 {offsets = [0, 0], sizes = [4, 16], strides = [1, 1]} : vector<4x96xf32> to vector<4x16xf32>
    %190 = arith.truncf %189 : vector<4x16xf32> to vector<4x16xbf16>
    %191 = vector.extract_strided_slice %188 {offsets = [0, 32], sizes = [4, 16], strides = [1, 1]} : vector<4x96xf32> to vector<4x16xf32>
    %192 = arith.truncf %191 : vector<4x16xf32> to vector<4x16xbf16>
    %193 = vector.extract_strided_slice %188 {offsets = [0, 64], sizes = [4, 16], strides = [1, 1]} : vector<4x96xf32> to vector<4x16xf32>
    %194 = arith.truncf %193 : vector<4x16xf32> to vector<4x16xbf16>
    %cst_74 = arith.constant dense<0.000000e+00> : vector<4x4xf32>
    %195 = tpu.matmul %190, %192, %cst_74 {dimension_numbers = #tpu.dot_dimension_numbers<[1], [1], [0], [0], [0, 0, 1, 0], [], []>} : vector<4x16xbf16>, vector<4x16xbf16>, vector<4x4xf32> -> vector<4x4xf32>
    %cst_75 = arith.constant dense<0xFF800000> : vector<4xf32>
    %196 = vector.multi_reduction <maximumf>, %195, %cst_75 [1] : vector<4x4xf32> to vector<4xf32>
    %197 = vector.shape_cast %196 : vector<4xf32> to vector<4x1xf32>
    %198 = vector.broadcast %197 : vector<4x1xf32> to vector<4x4xf32>
    %199 = arith.subf %195, %198 : vector<4x4xf32>
    %200 = math.exp %199 : vector<4x4xf32>
    %cst_76 = arith.constant dense<0.000000e+00> : vector<4xf32>
    %201 = vector.multi_reduction <add>, %200, %cst_76 [1] : vector<4x4xf32> to vector<4xf32>
    %202 = vector.shape_cast %201 : vector<4xf32> to vector<4x1xf32>
    %203 = tpu.reciprocal %202 {approx = true} : vector<4x1xf32> -> vector<4x1xf32>
    %204 = vector.broadcast %203 : vector<4x1xf32> to vector<4x4xf32>
    %205 = arith.mulf %200, %204 : vector<4x4xf32>
    %206 = arith.truncf %205 : vector<4x4xf32> to vector<4x4xbf16>
    %cst_77 = arith.constant dense<0.000000e+00> : vector<4x16xf32>
    %207 = tpu.matmul %206, %194, %cst_77 {dimension_numbers = #tpu.dot_dimension_numbers<[1], [0], [0], [1], [0, 0, 1, 1], [], []>} : vector<4x4xbf16>, vector<4x16xbf16>, vector<4x16xf32> -> vector<4x16xf32>
    %208 = arith.truncf %207 : vector<4x16xf32> to vector<4x16xbf16>
    %209 = vector.extract_strided_slice %164 {offsets = [0, 0], sizes = [16, 32], strides = [1, 1]} : vector<32x32xbf16> to vector<16x32xbf16>
    %cst_78 = arith.constant dense<0.000000e+00> : vector<4x32xf32>
    %210 = tpu.matmul %208, %209, %cst_78 {dimension_numbers = #tpu.dot_dimension_numbers<[1], [0], [0], [1], [0, 0, 1, 1], [], []>} : vector<4x16xbf16>, vector<16x32xbf16>, vector<4x32xf32> -> vector<4x32xf32>
    %211 = vector.extract_strided_slice %188 {offsets = [0, 16], sizes = [4, 16], strides = [1, 1]} : vector<4x96xf32> to vector<4x16xf32>
    %212 = arith.truncf %211 : vector<4x16xf32> to vector<4x16xbf16>
    %213 = vector.extract_strided_slice %188 {offsets = [0, 48], sizes = [4, 16], strides = [1, 1]} : vector<4x96xf32> to vector<4x16xf32>
    %214 = arith.truncf %213 : vector<4x16xf32> to vector<4x16xbf16>
    %215 = vector.extract_strided_slice %188 {offsets = [0, 80], sizes = [4, 16], strides = [1, 1]} : vector<4x96xf32> to vector<4x16xf32>
    %216 = arith.truncf %215 : vector<4x16xf32> to vector<4x16xbf16>
    %cst_79 = arith.constant dense<0.000000e+00> : vector<4x4xf32>
    %217 = tpu.matmul %212, %214, %cst_79 {dimension_numbers = #tpu.dot_dimension_numbers<[1], [1], [0], [0], [0, 0, 1, 0], [], []>} : vector<4x16xbf16>, vector<4x16xbf16>, vector<4x4xf32> -> vector<4x4xf32>
    %cst_80 = arith.constant dense<0xFF800000> : vector<4xf32>
    %218 = vector.multi_reduction <maximumf>, %217, %cst_80 [1] : vector<4x4xf32> to vector<4xf32>
    %219 = vector.shape_cast %218 : vector<4xf32> to vector<4x1xf32>
    %220 = vector.broadcast %219 : vector<4x1xf32> to vector<4x4xf32>
    %221 = arith.subf %217, %220 : vector<4x4xf32>
    %222 = math.exp %221 : vector<4x4xf32>
    %cst_81 = arith.constant dense<0.000000e+00> : vector<4xf32>
    %223 = vector.multi_reduction <add>, %222, %cst_81 [1] : vector<4x4xf32> to vector<4xf32>
    %224 = vector.shape_cast %223 : vector<4xf32> to vector<4x1xf32>
    %225 = tpu.reciprocal %224 {approx = true} : vector<4x1xf32> -> vector<4x1xf32>
    %226 = vector.broadcast %225 : vector<4x1xf32> to vector<4x4xf32>
    %227 = arith.mulf %222, %226 : vector<4x4xf32>
    %228 = arith.truncf %227 : vector<4x4xf32> to vector<4x4xbf16>
    %cst_82 = arith.constant dense<0.000000e+00> : vector<4x16xf32>
    %229 = tpu.matmul %228, %216, %cst_82 {dimension_numbers = #tpu.dot_dimension_numbers<[1], [0], [0], [1], [0, 0, 1, 1], [], []>} : vector<4x4xbf16>, vector<4x16xbf16>, vector<4x16xf32> -> vector<4x16xf32>
    %230 = arith.truncf %229 : vector<4x16xf32> to vector<4x16xbf16>
    %231 = vector.extract_strided_slice %164 {offsets = [16, 0], sizes = [16, 32], strides = [1, 1]} : vector<32x32xbf16> to vector<16x32xbf16>
    %cst_83 = arith.constant dense<0.000000e+00> : vector<4x32xf32>
    %232 = tpu.matmul %230, %231, %cst_83 {dimension_numbers = #tpu.dot_dimension_numbers<[1], [0], [0], [1], [0, 0, 1, 1], [], []>} : vector<4x16xbf16>, vector<16x32xbf16>, vector<4x32xf32> -> vector<4x32xf32>
    %233 = arith.addf %210, %232 : vector<4x32xf32>
    %234 = arith.addf %151, %233 : vector<4x32xf32>
    %235 = vector.broadcast %156 : vector<1x32xf32> to vector<4x32xf32>
    %236 = arith.addf %234, %235 : vector<4x32xf32>
    %cst_84 = arith.constant dense<0.000000e+00> : vector<4xf32>
    %237 = vector.multi_reduction <add>, %236, %cst_84 [1] : vector<4x32xf32> to vector<4xf32>
    %238 = vector.shape_cast %237 : vector<4xf32> to vector<4x1xf32>
    %cst_85 = arith.constant 3.200000e+01 : f32
    %239 = vector.broadcast %cst_85 : f32 to vector<4x1xf32>
    %240 = arith.divf %238, %239 : vector<4x1xf32>
    %241 = vector.broadcast %240 : vector<4x1xf32> to vector<4x32xf32>
    %242 = arith.subf %236, %241 : vector<4x32xf32>
    %243 = arith.mulf %242, %242 : vector<4x32xf32>
    %cst_86 = arith.constant dense<0.000000e+00> : vector<4xf32>
    %244 = vector.multi_reduction <add>, %243, %cst_86 [1] : vector<4x32xf32> to vector<4xf32>
    %245 = vector.shape_cast %244 : vector<4xf32> to vector<4x1xf32>
    %cst_87 = arith.constant 3.200000e+01 : f32
    %246 = vector.broadcast %cst_87 : f32 to vector<4x1xf32>
    %247 = arith.divf %245, %246 : vector<4x1xf32>
    %248 = vector.broadcast %240 : vector<4x1xf32> to vector<4x32xf32>
    %249 = arith.subf %236, %248 : vector<4x32xf32>
    %cst_88 = arith.constant 9.99999974E-6 : f32
    %250 = vector.broadcast %cst_88 : f32 to vector<4x1xf32>
    %251 = arith.addf %247, %250 : vector<4x1xf32>
    %252 = math.rsqrt %251 : vector<4x1xf32>
    %253 = vector.broadcast %252 : vector<4x1xf32> to vector<4x32xf32>
    %254 = arith.mulf %249, %253 : vector<4x32xf32>
    %255 = vector.broadcast %157 : vector<1x32xf32> to vector<4x32xf32>
    %256 = arith.mulf %254, %255 : vector<4x32xf32>
    %257 = vector.broadcast %158 : vector<1x32xf32> to vector<4x32xf32>
    %258 = arith.addf %256, %257 : vector<4x32xf32>
    %259 = arith.truncf %258 : vector<4x32xf32> to vector<4x32xbf16>
    %c1_89 = arith.constant 1 : index
    %c0_90 = arith.constant 0 : index
    %c0_91 = arith.constant 0 : index
    %260 = vector.load %arg7[%c1_89, %c0_90, %c0_91] : memref<2x32x64xbf16, #tpu.memory_space<vmem>>, vector<1x32x64xbf16>
    %261 = vector.shape_cast %260 : vector<1x32x64xbf16> to vector<32x64xbf16>
    %cst_92 = arith.constant dense<0.000000e+00> : vector<4x64xf32>
    %262 = tpu.matmul %259, %261, %cst_92 {dimension_numbers = #tpu.dot_dimension_numbers<[1], [0], [0], [1], [0, 0, 1, 1], [], []>} : vector<4x32xbf16>, vector<32x64xbf16>, vector<4x64xf32> -> vector<4x64xf32>
    %263 = vector.broadcast %159 : vector<1x64xf32> to vector<4x64xf32>
    %264 = arith.addf %262, %263 : vector<4x64xf32>
    %265 = arith.mulf %264, %264 : vector<4x64xf32>
    %266 = arith.mulf %264, %265 : vector<4x64xf32>
    %cst_93 = arith.constant 4.471500e-02 : f32
    %267 = vector.broadcast %cst_93 : f32 to vector<4x64xf32>
    %268 = arith.mulf %267, %266 : vector<4x64xf32>
    %269 = arith.addf %264, %268 : vector<4x64xf32>
    %cst_94 = arith.constant 0.797884583 : f32
    %270 = vector.broadcast %cst_94 : f32 to vector<4x64xf32>
    %271 = arith.mulf %270, %269 : vector<4x64xf32>
    %272 = math.tanh %271 : vector<4x64xf32>
    %cst_95 = arith.constant 1.000000e+00 : f32
    %273 = vector.broadcast %cst_95 : f32 to vector<4x64xf32>
    %274 = arith.addf %273, %272 : vector<4x64xf32>
    %cst_96 = arith.constant 5.000000e-01 : f32
    %275 = vector.broadcast %cst_96 : f32 to vector<4x64xf32>
    %276 = arith.mulf %275, %274 : vector<4x64xf32>
    %277 = arith.mulf %264, %276 : vector<4x64xf32>
    %278 = arith.truncf %277 : vector<4x64xf32> to vector<4x64xbf16>
    %c1_97 = arith.constant 1 : index
    %c0_98 = arith.constant 0 : index
    %c0_99 = arith.constant 0 : index
    %279 = vector.load %arg8[%c1_97, %c0_98, %c0_99] : memref<2x64x32xbf16, #tpu.memory_space<vmem>>, vector<1x64x32xbf16>
    %280 = vector.shape_cast %279 : vector<1x64x32xbf16> to vector<64x32xbf16>
    %cst_100 = arith.constant dense<0.000000e+00> : vector<4x32xf32>
    %281 = tpu.matmul %278, %280, %cst_100 {dimension_numbers = #tpu.dot_dimension_numbers<[1], [0], [0], [1], [0, 0, 1, 1], [], []>} : vector<4x64xbf16>, vector<64x32xbf16>, vector<4x32xf32> -> vector<4x32xf32>
    %282 = arith.addf %258, %281 : vector<4x32xf32>
    %283 = vector.broadcast %160 : vector<1x32xf32> to vector<4x32xf32>
    %284 = arith.addf %282, %283 : vector<4x32xf32>
    %c0_101 = arith.constant 0 : index
    %c0_102 = arith.constant 0 : index
    %285 = vector.load %arg10[%c0_101, %c0_102] : memref<8x128xf32, #tpu.memory_space<vmem>>, vector<8x128xf32>
    %286 = vector.extract_strided_slice %285 {offsets = [0, 0], sizes = [1, 32], strides = [1, 1]} : vector<8x128xf32> to vector<1x32xf32>
    %287 = vector.extract_strided_slice %285 {offsets = [1, 0], sizes = [1, 32], strides = [1, 1]} : vector<8x128xf32> to vector<1x32xf32>
    %288 = vector.extract_strided_slice %285 {offsets = [2, 0], sizes = [1, 32], strides = [1, 1]} : vector<8x128xf32> to vector<1x32xf32>
    %289 = vector.extract_strided_slice %285 {offsets = [3, 0], sizes = [1, 1], strides = [1, 1]} : vector<8x128xf32> to vector<1x1xf32>
    %290 = vector.extract_strided_slice %285 {offsets = [4, 0], sizes = [1, 128], strides = [1, 1]} : vector<8x128xf32> to vector<1x128xf32>
    %cst_103 = arith.constant dense<0.000000e+00> : vector<4xf32>
    %291 = vector.multi_reduction <add>, %284, %cst_103 [1] : vector<4x32xf32> to vector<4xf32>
    %292 = vector.shape_cast %291 : vector<4xf32> to vector<4x1xf32>
    %cst_104 = arith.constant 3.200000e+01 : f32
    %293 = vector.broadcast %cst_104 : f32 to vector<4x1xf32>
    %294 = arith.divf %292, %293 : vector<4x1xf32>
    %295 = vector.broadcast %294 : vector<4x1xf32> to vector<4x32xf32>
    %296 = arith.subf %284, %295 : vector<4x32xf32>
    %297 = arith.mulf %296, %296 : vector<4x32xf32>
    %cst_105 = arith.constant dense<0.000000e+00> : vector<4xf32>
    %298 = vector.multi_reduction <add>, %297, %cst_105 [1] : vector<4x32xf32> to vector<4xf32>
    %299 = vector.shape_cast %298 : vector<4xf32> to vector<4x1xf32>
    %cst_106 = arith.constant 3.200000e+01 : f32
    %300 = vector.broadcast %cst_106 : f32 to vector<4x1xf32>
    %301 = arith.divf %299, %300 : vector<4x1xf32>
    %302 = vector.broadcast %294 : vector<4x1xf32> to vector<4x32xf32>
    %303 = arith.subf %284, %302 : vector<4x32xf32>
    %cst_107 = arith.constant 9.99999974E-6 : f32
    %304 = vector.broadcast %cst_107 : f32 to vector<4x1xf32>
    %305 = arith.addf %301, %304 : vector<4x1xf32>
    %306 = math.rsqrt %305 : vector<4x1xf32>
    %307 = vector.broadcast %306 : vector<4x1xf32> to vector<4x32xf32>
    %308 = arith.mulf %303, %307 : vector<4x32xf32>
    %309 = vector.broadcast %286 : vector<1x32xf32> to vector<4x32xf32>
    %310 = arith.mulf %308, %309 : vector<4x32xf32>
    %311 = vector.broadcast %287 : vector<1x32xf32> to vector<4x32xf32>
    %312 = arith.addf %310, %311 : vector<4x32xf32>
    %313 = vector.broadcast %288 : vector<1x32xf32> to vector<4x32xf32>
    %314 = arith.mulf %312, %313 : vector<4x32xf32>
    %cst_108 = arith.constant dense<0.000000e+00> : vector<4xf32>
    %315 = vector.multi_reduction <add>, %314, %cst_108 [1] : vector<4x32xf32> to vector<4xf32>
    %316 = vector.shape_cast %315 : vector<4xf32> to vector<4x1xf32>
    %317 = vector.broadcast %289 : vector<1x1xf32> to vector<4x1xf32>
    %318 = arith.addf %316, %317 : vector<4x1xf32>
    %cst_109 = arith.constant dense<0xFF800000> : vector<1xf32>
    %319 = vector.multi_reduction <maximumf>, %318, %cst_109 [0] : vector<4x1xf32> to vector<1xf32>
    %320 = vector.shape_cast %319 : vector<1xf32> to vector<1x1xf32>
    %321 = vector.broadcast %320 : vector<1x1xf32> to vector<4x1xf32>
    %322 = arith.subf %318, %321 : vector<4x1xf32>
    %323 = math.exp %322 : vector<4x1xf32>
    %cst_110 = arith.constant dense<0.000000e+00> : vector<1xf32>
    %324 = vector.multi_reduction <add>, %323, %cst_110 [0] : vector<4x1xf32> to vector<1xf32>
    %325 = vector.shape_cast %324 : vector<1xf32> to vector<1x1xf32>
    %326 = tpu.reciprocal %325 {approx = true} : vector<1x1xf32> -> vector<1x1xf32>
    %327 = vector.broadcast %326 : vector<1x1xf32> to vector<4x1xf32>
    %328 = arith.mulf %323, %327 : vector<4x1xf32>
    %329 = vector.broadcast %328 : vector<4x1xf32> to vector<4x32xf32>
    %330 = arith.mulf %329, %312 : vector<4x32xf32>
    %cst_111 = arith.constant dense<0.000000e+00> : vector<32xf32>
    %331 = vector.multi_reduction <add>, %330, %cst_111 [0] : vector<4x32xf32> to vector<32xf32>
    %332 = vector.shape_cast %331 : vector<32xf32> to vector<1x32xf32>
    %333 = arith.truncf %332 : vector<1x32xf32> to vector<1x32xbf16>
    %c0_112 = arith.constant 0 : index
    %c0_113 = arith.constant 0 : index
    %334 = vector.load %arg11[%c0_112, %c0_113] : memref<32x128xbf16, #tpu.memory_space<vmem>>, vector<32x128xbf16>
    %cst_114 = arith.constant dense<0.000000e+00> : vector<1x128xf32>
    %335 = tpu.matmul %333, %334, %cst_114 {dimension_numbers = #tpu.dot_dimension_numbers<[1], [0], [0], [1], [0, 0, 1, 1], [], []>} : vector<1x32xbf16>, vector<32x128xbf16>, vector<1x128xf32> -> vector<1x128xf32>
    %336 = arith.addf %335, %290 : vector<1x128xf32>
    %337 = vector.shape_cast %336 : vector<1x128xf32> to vector<1x1x128xf32>
    %c0_115 = arith.constant 0 : index
    %c0_116 = arith.constant 0 : index
    %c0_117 = arith.constant 0 : index
    %338 = vector.load %arg12[%c0_115, %c0_116, %c0_117] : memref<1x1x128xf32, #tpu.memory_space<vmem>>, vector<1x1x128xf32>
    tpu.vector_store %arg12[%c0_115, %c0_116, %c0_117], %337 {strides = array<i32>} : memref<1x1x128xf32, #tpu.memory_space<vmem>>, vector<1x1x128xf32>,
    return
  }
  func.func @transform_0(%arg0: i32) -> (i32, i32, i32) {
    %c0_i32 = arith.constant 0 : i32
    %c0_i32_0 = arith.constant 0 : i32
    %c0_i32_1 = arith.constant 0 : i32
    return %arg0, %c0_i32, %c0_i32_0 : i32, i32, i32
  }
  func.func @transform_1(%arg0: i32) -> (i32, i32) {
    %c0_i32 = arith.constant 0 : i32
    %c0_i32_0 = arith.constant 0 : i32
    %c0_i32_1 = arith.constant 0 : i32
    return %c0_i32, %c0_i32_0 : i32, i32
  }
  func.func @transform_2(%arg0: i32) -> (i32, i32, i32) {
    %c0_i32 = arith.constant 0 : i32
    %c0_i32_0 = arith.constant 0 : i32
    %c0_i32_1 = arith.constant 0 : i32
    %c0_i32_2 = arith.constant 0 : i32
    return %c0_i32, %c0_i32_0, %c0_i32_1 : i32, i32, i32
  }
  func.func @transform_3(%arg0: i32) -> (i32, i32) {
    %c0_i32 = arith.constant 0 : i32
    %c0_i32_0 = arith.constant 0 : i32
    %c0_i32_1 = arith.constant 0 : i32
    return %c0_i32, %c0_i32_0 : i32, i32
  }
  func.func @transform_4(%arg0: i32) -> (i32, i32, i32) {
    %c0_i32 = arith.constant 0 : i32
    %c0_i32_0 = arith.constant 0 : i32
    %c0_i32_1 = arith.constant 0 : i32
    %c0_i32_2 = arith.constant 0 : i32
    return %c0_i32, %c0_i32_0, %c0_i32_1 : i32, i32, i32
  }
  func.func @transform_5(%arg0: i32) -> (i32, i32, i32) {
    %c0_i32 = arith.constant 0 : i32
    %c0_i32_0 = arith.constant 0 : i32
    %c0_i32_1 = arith.constant 0 : i32
    %c0_i32_2 = arith.constant 0 : i32
    return %c0_i32, %c0_i32_0, %c0_i32_1 : i32, i32, i32
  }
  func.func @transform_6(%arg0: i32) -> (i32, i32, i32) {
    %c0_i32 = arith.constant 0 : i32
    %c0_i32_0 = arith.constant 0 : i32
    %c0_i32_1 = arith.constant 0 : i32
    %c0_i32_2 = arith.constant 0 : i32
    return %c0_i32, %c0_i32_0, %c0_i32_1 : i32, i32, i32
  }
  func.func @transform_7(%arg0: i32) -> (i32, i32, i32) {
    %c0_i32 = arith.constant 0 : i32
    %c0_i32_0 = arith.constant 0 : i32
    %c0_i32_1 = arith.constant 0 : i32
    %c0_i32_2 = arith.constant 0 : i32
    return %c0_i32, %c0_i32_0, %c0_i32_1 : i32, i32, i32
  }
  func.func @transform_8(%arg0: i32) -> (i32, i32, i32) {
    %c0_i32 = arith.constant 0 : i32
    %c0_i32_0 = arith.constant 0 : i32
    %c0_i32_1 = arith.constant 0 : i32
    %c0_i32_2 = arith.constant 0 : i32
    return %c0_i32, %c0_i32_0, %c0_i32_1 : i32, i32, i32
  }
  func.func @transform_9(%arg0: i32) -> (i32, i32) {
    %c0_i32 = arith.constant 0 : i32
    %c0_i32_0 = arith.constant 0 : i32
    %c0_i32_1 = arith.constant 0 : i32
    return %c0_i32, %c0_i32_0 : i32, i32
  }
  func.func @transform_10(%arg0: i32) -> (i32, i32) {
    %c0_i32 = arith.constant 0 : i32
    %c0_i32_0 = arith.constant 0 : i32
    %c0_i32_1 = arith.constant 0 : i32
    return %c0_i32, %c0_i32_0 : i32, i32
  }
  func.func @transform_11(%arg0: i32) -> (i32, i32, i32) {
    %c0_i32 = arith.constant 0 : i32
    %c0_i32_0 = arith.constant 0 : i32
    %c0_i32_1 = arith.constant 0 : i32
    return %arg0, %c0_i32, %c0_i32_0 : i32, i32, i32
  }
}

</mosaic_0001>

<bundles_post_ra>
// kernel: oct_forward.1
= control target key start
LH: loop header
LB: loop body
LE: loop exit
PB: predicated region body
PF: predicated region fallthrough
CT: control target
= control target key end

     0   :  { %s2997_s0 = inlined_call_operand.vmem [shape: bf16[2,8,7], index: 0, kind: input, shape index: {}]   ;;  %s2998_s1 = inlined_call_operand.vmem [shape: bf16[7,32], index: 1, kind: input, shape index: {}]   ;;  %s2999_s2 = inlined_call_operand.vmem [shape: f32[3,4,8], index: 2, kind: input, shape index: {}]   ;;  %s3000_s3 = inlined_call_operand.vmem [shape: f32[4,32], index: 3, kind: input, shape index: {}]   ;;  %s3001_s4 = inlined_call_operand.vmem [shape: bf16[2,32,96], index: 4, kind: input, shape index: {}]   ;;  %s3002_s5 = inlined_call_operand.vmem [shape: bf16[2,32,32], index: 5, kind: input, shape index: {}]   ;;  %s3003_s6 = inlined_call_operand.vmem [shape: bf16[2,32,64], index: 6, kind: input, shape index: {}]   ;;  %s3004_s7 = inlined_call_operand.vmem [shape: bf16[2,64,32], index: 7, kind: input, shape index: {}]   ;;  %s3005_s8 = inlined_call_operand.vmem [shape: f32[2,8,64], index: 8, kind: input, shape index: {}]   ;;  %s3006_s9 = inlined_call_operand.vmem [shape: f32[8,128], index: 9, kind: input, shape index: {}]   ;;  %s3007_s10 = inlined_call_operand.vmem [shape: bf16[32,128], index: 10, kind: input, shape index: {}]   ;;  %s3008_s11 = inlined_call_operand.hbm [shape: f32[2,1,128], index: 11, kind: output, shape index: {}]  }
   0x1   :  { %3011 = sst [smem:[#allocation5_spill]] %s2997_s0 }
   0x2   :  { %16 = vsyncpa [#allocation3], 0 }
   0x3   :  { %18 = vsyncpa [#allocation3 + $0x1], 0  ;;  %s2592_s17 = smov 0   ;;  %s2594_s18 = smov 0  }
   0x4   :  { %s2596_s19 = smov 0   ;;  %s2598_s20 = smov 0  }
   0x5 LB: > { %s2613_s21 = sadd.s32 4294967295, %s2520_s20   ;;  %s2064_s22 = sadd.s32 4294967294, %s2520_s20   ;;  %s2520_s20 = sphi %s2598_s20, %s3020_s20   ;;  %s2516_s19 = sphi %s2596_s19, %s3019_s19   ;;  %s2512_s18 = sphi %s2594_s18, %s3018_s18   ;;  %s2508_s17 = sphi %s2592_s17, %s3017_s17  }
   0x6   : > { %s2617_s23 = sadd.s32 1, %s2520_s20   ;;  %s267_s24 = sadd.s32 1, %s2516_s19 }
   0x7   : > { %s264_s25 = ssub.s32 %s2520_s20, %s2617_s23  ;;  %p277_p0 = scmp.ne.s32.totalorder %s2516_s19, %s2512_s18 }
   0x8   : > { %p265_p1 = scmp.eq.s32.totalorder %s264_s25, 0  ;;  %p278_p2 = scmp.eq.s32.totalorder %s2613_s21, 1 }
   0x9   : > { %p283_p3 = scmp.ne.s32.totalorder %s2512_s18, %s2508_s17  ;;  %p284_p4 = scmp.eq.s32.totalorder %s2064_s22, 1 }
   0xa   : > { %s2628_s26 = scalar_select %p265_p1, %s2516_s19, %s267_s24  }
   0xb   : > { %p2630_p5 = por %p278_p2, %p277_p0  ;;  %p2634_p6 = por %p284_p4, %p283_p3 }
   0xc   : > { %p2067_p7 = scmp.ge.s32.totalorder %s2520_s20, 1  ;;  %p339_p8 = scmp.lt.s32.totalorder %s2520_s20, 3 }
   0xe   : > { %p340_p9 = pnand %p2067_p7, %p339_p8 }
   0xf   : > { %p377_p10 = scmp.lt.s32.totalorder (!%p340_p9), %s2613_s21, 1  ;;  %s3014_s0 = sld [smem:[#allocation5_spill]] (!%p340_p9) }
  0x10   : > { %343 = sbr.rel (%p340_p9) target bundleno = 5833 (0x16c9), region = 64  ;;  %s2525_s30 = smov (!%p340_p9), 112  }
  0x11   : > { %s3009_s14 = smov (!%p340_p9), 48   ;;  %s3010_s15 = smov (!%p340_p9), 64  }
  0x15   : > { %v383_v0 = vld [vmem:[%s2998_s1] sm:$0xf]  ;;  %vm388_vm0 = vcmask 1042432   ;;  %vm389_vm1 = vcmask 1043456   ;;  %v2522_v1 = vmov 0.0   ;;  %v2523_v2 = vmov 65535  }
  0x16   : > { %2197 = vmatprep.subr.bf16.mxu0 %v2522_v1  ;;  %v390_v3 = vsel %vm388_vm0, 4294967295, %v2523_v2  ;;  %2203 = vmatprep.subr.mxu1 %v2522_v1  ;;  %vm2524_vm2 = vmmov 0   ;;  %s378_s12 = scalar_select %p377_p10, %s2613_s21, 1  ;;  %vm384_vm3 = vcmask 56320   ;;  %v436_v9 = vld [vmem:[%s2999_s2] sm:$0xf]  ;;  %v689_v36 = vlaneseq }
  0x17   : > { %v391_v4 = vsel %vm389_vm1, %v390_v3, 0  ;;  %2199 = vmatprep.mubr.msk.bf16.mxu0 %vm2524_vm2, %v2522_v1  ;;  %2205 = vmatprep.mubr.msk.f32.mxu1 %vm2524_vm2, %v2522_v1  ;;  %vm437_vm4 = vcmask 64512   ;;  %v2071_v12 = vld [vmem:[%s2999_s2 + $0x4] sm:$0xf]  ;;  %v2073_v14 = vld [vmem:[%s2999_s2 + $0x8] sm:$0xf] }
  0x18   : > { %v393_v5 = vand.u32 %v391_v4, %v383_v0  ;;  %s2068_s13 = sshll.u32 %s378_s12, 2  ;;  %v663_v21 = vld [vmem:[%s3000_s3] sm:$0xf]  ;;  %vm674_vm5 = vcmask 257024   ;;  %v2404_v31 = vld [vmem:[%s3001_s4 + $0x8] sm:$0xff]   ;;  %v2695_v37 = vshrl.u32 %v689_v36, 7 }
  0x19   : > { %s380_s16 = scalar_lea.vmem %s3014_s0, %s2068_s13  ;;  %v2405_v32 = vld [vmem:[%s3001_s4] sm:$0xff]   ;;  %vm712_vm6 = vcmask 261120   ;;  %s2526_s12 = smov 96   ;;  %vm760_vm7 = vcmask 130048   ;;  %vm807_vm8 = vcmask 27648   ;;  %vm826_vm9 = vcmask 1041408  }
  0x1a   : > { %2198 = vmatpush3.bf16.msra.mxu0 %v393_v5  ;;  %v382_v6 = vld [vmem:[%s380_s16] sm:$0xf]  ;;  %v2698_v38 = vsub.s32 0, %v2695_v37  ;;  %v2706_v40 = vsub.s32 1, %v2695_v37  ;;  %s2527_s13 = smov 80   ;;  %vm822_vm10 = vcmask 31744  }
  0x1b   : > { %2218 = vmatprep.subr.bf16.mxu0 %v2522_v1  ;;  %v2703_v39 = vld [vmem:[%s3005_s8] sm:$0xff]  ;;  %vm1215_vm11 = vcmask 523264   ;;  %vm1899_vm12 = vcmask 3072  }
  0x1c   : > { %v692_v41 = vrot.slane %v2703_v39, %v2698_v38  ;;  %v697_v44 = vrot.slane %v2703_v39, %v2706_v40 }
  0x1d   : > { %2200 = vmatmul.mubr.msk.bf16.vlgmr.msra.gmra.mxu0 %vm384_vm3, %v382_v6 }
  0x1e   : > { %2222 = vmatprep.mubr.msk.bf16.mxu0 %vm2524_vm2, %v2522_v1  ;;  %2219 = vmatpush3.bf16.msra.mxu0 %v2404_v31 }
  0x1f   : > { %2220 = vmatprep.subr.bf16.mxu0 %v2522_v1 }
  0x22   : > { %2221 = vmatpush3.bf16.msra.mxu0 %v2405_v32 }
  0x23   : > { %2232 = vmatprep.subr.bf16.mxu0 %v2522_v1 }
  0xdd   : > { %v429_v7 = vpop.f32.mrf.mxu0 }
  0xde   : > { %v435_v8 = vmax.f32 %v429_v7, 0.0 }
  0xdf   : > { %v2201_v10 = vpop.f32.mrf.mxu0 }
  0xe0   : > { %2204 = vmatpush3.msra.mxu1 %v435_v8 }
  0xe1   : > { %v432_v11 = vpop.f32.mrf.mxu0  ;;  %2206 = vmatmul.mubr.msk.f32.vlgmr.msra.gmra.mxu1 %vm437_vm4, %v436_v9  ;;  %2208 = vmatprep.subr.mxu1 %v2522_v1 }
  0xe2   : > { %2209 = vmatpush3.msra.mxu1 %v435_v8  ;;  %2210 = vmatprep.mubr.msk.f32.mxu1 %vm2524_vm2, %v2522_v1 }
  0xe3   : > { %v2202_v13 = vpop.f32.mrf.mxu0  ;;  %2213 = vmatprep.subr.mxu1 %v2522_v1 }
  0xe5   : > { %2211 = vmatmul.mubr.msk.f32.vlgmr.msra.gmra.mxu1 %vm437_vm4, %v2071_v12 }
  0xe6   : > { %2214 = vmatpush3.msra.mxu1 %v435_v8  ;;  %2215 = vmatprep.mubr.msk.f32.mxu1 %vm2524_vm2, %v2522_v1 }
  0xe7   : > { %2226 = vmatprep.subr.bf16.mxu1 %v2522_v1 }
  0xe9   : > { %2216 = vmatmul.mubr.msk.f32.vlgmr.msra.gmra.mxu1 %vm437_vm4, %v2073_v14 }
  0xea   : > { %2228 = vmatprep.mubr.msk.bf16.mxu1 %vm2524_vm2, %v2522_v1 }
 0x1a1   : > { %v507_v15 = vpop.f32.mrf.mxu1 }
 0x1a3   : > { %v2207_v16 = vpop.f32.mrf.mxu1 }
 0x1a5   : > { %v582_v17 = vpop.f32.mrf.mxu1 }
 0x1a6   : > { %v661_v19 = vmax.f32 %v507_v15, %v582_v17 }
 0x1a7   : > { %v2212_v18 = vpop.f32.mrf.mxu1 }
 0x1a9   : > { %v657_v20 = vpop.f32.mrf.mxu1 }
 0x1aa   : > { %v662_v22 = vmax.f32 %v661_v19, %v657_v20 }
 0x1ab   : > { %v2217_v23 = vpop.f32.mrf.mxu1 }
 0x1ac   : > { %v2681_v24 = vadd.f32 %v663_v21, %v662_v22 }
 0x1ae   : > { %v675_v25 = vsel %vm674_vm5, %v2681_v24, 0.0 }
 0x1af   : > { %676 = vadd.xlane.f32.xlu0 %v675_v25 }
 0x238   : > { %v677_v26 = vpop.xlane.xlu0 %676 }
 0x239   : > { %v679_v27 = vmul.f32 0.03125, %v677_v26 }
 0x23b   : > { %v680_v28 = vsub.f32 %v2681_v24, %v679_v27 }
 0x23d   : > { %v681_v29 = vmul.f32 %v680_v28, %v680_v28 }
 0x23f   : > { %v682_v30 = vsel %vm674_vm5, %v681_v29, 0.0  ;;  %v2407_v29 = vld [vmem:[%s3002_s5 + $0x8] sm:$0xff]  }
 0x240   : > { %683 = vadd.xlane.f32.xlu0 %v682_v30 }
 0x2c9   : > { %v684_v33 = vpop.xlane.xlu0 %683 }
 0x2ca   : > { %v685_v34 = vmul.f32 0.03125, %v684_v33 }
 0x2cc   : > { %v686_v35 = vadd.f32 1e-05, %v685_v34 }
 0x2ce   : > { %2426 = vrsqrt.f32 %v686_v35 }
 0x2db   : > { %v2427_v42 = vpop.eup %2426 }
 0x2dc   : > { %v688_v43 = vmul.f32 %v2427_v42, %v680_v28  ;;  %v2406_v28 = vld [vmem:[%s3002_s5] sm:$0xff]  }
 0x2de   : > { %v693_v45 = vmul.f32 %v692_v41, %v688_v43 }
 0x2e0   : > { %v698_v46 = vadd.f32 %v697_v44, %v693_v45 }
 0x2e2   : > { %v699_v47 = vpack.c.bf16 %v698_v46, %v698_v46 }
 0x2e4   : > { %2223 = vmatmul.mubr.msk.bf16.vlgmr.msra.gmra.mxu0 %vm712_vm6, %v699_v47  ;;  %v2759_v47 = vsub.s32 2, %v2695_v37 }
 0x2e5   : > { %2234 = vmatprep.mubr.msk.bf16.mxu0 %vm2524_vm2, %v2522_v1 }
 0x3a4   : > { %v750_v48 = vpop.f32.mrf.mxu0 }
 0x3a5   : > { %v756_v49 = vpack.c.bf16 %v750_v48, %v750_v48 }
 0x3a6   : > { %v2224_v50 = vpop.f32.mrf.mxu0 }
 0x3a7   : > { %871 = vrot.lane.b32.xlu0 %v756_v49, %s2525_s30  ;;  %758 = vrot.lane.b32.xlu1 %v756_v49, %s2526_s12 }
 0x3a8   : > { %v753_v51 = vpop.f32.mrf.mxu0 }
 0x3a9   : > { %v1084_v51 = vrot.slane %v2703_v39, %v2759_v47 }
 0x3aa   : > { %v2225_v52 = vpop.f32.mrf.mxu0 }
 0x3ab   : > { %873 = vrot.lane.b32.xlu1 %v756_v49, %s2527_s13 }
 0x419   : > { %v759_v53 = vpop.permute.xlu1 %758  ;;  %v872_v57 = vpop.permute.xlu0 %871 }
 0x41a   : > { %v765_v54 = vsel %vm760_vm7, %v759_v53, 0 }
 0x41b   : > { %2227 = vmatpush3.bf16.xpose.msra.mxu1 %v765_v54 }
 0x41c   : > { %2238 = vmatprep.subr.bf16.mxu1 %v2522_v1 }
 0x41d   : > { %v874_v55 = vpop.permute.xlu1 %873 }
 0x41e   : > { %v879_v56 = vsel %vm760_vm7, %v874_v55, 0 }
 0x422   : > { %2229 = vmatmul.mubr.msk.bf16.vlgmr.msra.gmra.mxu1 %vm760_vm7, %v756_v49 }
 0x423   : > { %2239 = vmatpush3.bf16.xpose.msra.mxu1 %v879_v56  ;;  %2240 = vmatprep.mubr.msk.bf16.mxu1 %vm2524_vm2, %v2522_v1 }
 0x424   : > { %2250 = vmatprep.subr.bf16.mxu1 %v2522_v1 }
 0x42a   : > { %2241 = vmatmul.mubr.msk.bf16.vlgmr.msra.gmra.mxu1 %vm760_vm7, %v872_v57 }
 0x42b   : > { %2252 = vmatprep.mubr.msk.bf16.mxu1 %vm2524_vm2, %v2522_v1  ;;  %2251 = vmatpush3.bf16.msra.mxu1 %v2407_v29 }
 0x42c   : > { %2262 = vmatprep.subr.bf16.mxu1 %v2522_v1 }
 0x4e2   : > { %v801_v58 = vpop.f32.mrf.mxu1 }
 0x4e3   : > { %v808_v59 = vsel %vm807_vm8, %v801_v58, -inf }
 0x4e4   : > { %809 = vmax.xlane.f32.xlu1 %v808_v59  ;;  %v2230_v60 = vpop.f32.mrf.mxu1 }
 0x4e6   : > { %v804_v61 = vpop.f32.mrf.mxu1 }
 0x4e8   : > { %v2231_v62 = vpop.f32.mrf.mxu1 }
 0x4ea   : > { %v915_v63 = vpop.f32.mrf.mxu1 }
 0x4eb   : > { %v921_v0 = vsel %vm807_vm8, %v915_v63, -inf }
 0x4ec   : > { %922 = vmax.xlane.f32.xlu0 %v921_v0  ;;  %v2242_v2 = vpop.f32.mrf.mxu1 }
 0x4ee   : > { %v918_v3 = vpop.f32.mrf.mxu1 }
 0x4f0   : > { %v2243_v4 = vpop.f32.mrf.mxu1 }
 0x4f1   : > { %v2775_v4 = vsub.s32 3, %v2695_v37 }
 0x502   : > { %933 = vrot.lane.b32.xlu0 %v756_v49, %s3009_s14  ;;  %s375_s14 = sand.u32 1, %s2512_s18  }
 0x503   : > { %s376_s29 = scalar_lea.vmem [#allocation2], %s375_s14 }
 0x504   : > { %s2009_s16 = sshll.u32 %s376_s29, 4  ;;  %s2958_s16 = int_to_ptr.vmem [resolvable:$true] %s2009_s16 }
 0x56d   : > { %v810_v5 = vpop.xlane.xlu1 %809 }
 0x56e   : > { %v811_v6 = vsub.f32 %v801_v58, %v810_v5  ;;  %v1106_v5 = vsub.s32 4, %v2695_v37 }
 0x570   : > { %v812_v7 = vmul.f32 1.442695, %v811_v6  ;;  %v1102_v6 = vrot.slane %v2703_v39, %v2775_v4 }
 0x572   : > { %2428 = vpow2.f32 %v812_v7 }
 0x575   : > { %v923_v8 = vpop.xlane.xlu0 %922 }
 0x576   : > { %v924_v9 = vsub.f32 %v915_v63, %v923_v8  ;;  %v2408_v63 = vld [vmem:[%s3003_s6 + $0x8] sm:$0xff]  }
 0x578   : > { %v925_v10 = vmul.f32 1.442695, %v924_v9  ;;  %v1107_v9 = vrot.slane %v2703_v39, %v1106_v5 }
 0x579   : > { %v934_v21 = vpop.permute.xlu0 %933 }
 0x57a   : > { %2430 = vpow2.f32 %v925_v10  ;;  %v939_v23 = vsel %vm826_vm9, %v934_v21, 0 }
 0x57f   : > { %v2429_v11 = vpop.eup %2428 }
 0x580   : > { %v814_v12 = vsel %vm807_vm8, %v2429_v11, 0.0 }
 0x581   : > { %815 = vadd.xlane.f32.xlu1 %v814_v12 }
 0x587   : > { %v2431_v13 = vpop.eup %2430 }
 0x588   : > { %v927_v14 = vsel %vm807_vm8, %v2431_v13, 0.0 }
 0x589   : > { %928 = vadd.xlane.f32.xlu1 %v927_v14  ;;  %v2411_v14 = vld [vmem:[%s3004_s7 + $0x10] sm:$0xff]  }
 0x59a   : > { %820 = vrot.lane.b32.xlu1 %v756_v49, %s3010_s15  ;;  %s2137_s15 = sshll.u32 %s2613_s21, 4  ;;  %s2531_s21 = smov [#allocation2]  }
 0x59b   : > { %s2464_s25 = sshll.u32 %s2531_s21, 4  ;;  %s2465_s25 = int_to_ptr.vmem [resolvable:$false] %s2464_s25 }
 0x59c   : > { %s2466_s22 = scalar_lea.vmem %s2465_s25, 32  ;;  %p2467_p0 = scmp.lt.s32.totalorder %s2958_s16, %s2465_s25 }
 0x60a   : > { %v816_v15 = vpop.xlane.xlu1 %815 }
 0x60b   : > { %2432 = vrcp.f32 %v816_v15  ;;  %v2412_v15 = vld [vmem:[%s3004_s7 + $0x8] sm:$0xff]  }
 0x612   : > { %v929_v16 = vpop.xlane.xlu1 %928 }
 0x613   : > { %2434 = vrcp.f32 %v929_v16  ;;  %v2413_v16 = vld [vmem:[%s3004_s7] sm:$0xff]  }
 0x616   : > { %v821_v17 = vpop.permute.xlu1 %820 }
 0x617   : > { %v828_v18 = vsel %vm826_vm9, %v821_v17, 0  ;;  %v1116_v17 = vsub.s32 5, %v2695_v37 }
 0x618   : > { %v2433_v19 = vpop.eup %2432  ;;  %2233 = vmatpush3.bf16.msra.mxu0 %v828_v18 }
 0x619   : > { %2244 = vmatprep.subr.bf16.mxu0 %v2522_v1  ;;  %v818_v20 = vmul.f32 %v2433_v19, %v2429_v11  ;;  %v1117_v18 = vrot.slane %v2703_v39, %v1116_v17 }
 0x61b   : > { %v819_v22 = vpack.c.bf16 %v818_v20, %v818_v20 }
 0x61d   : > { %2235 = vmatmul.mubr.msk.bf16.vlgmr.msra.gmra.mxu0 %vm822_vm10, %v819_v22 }
 0x61e   : > { %2245 = vmatpush3.bf16.msra.mxu0 %v939_v23  ;;  %2246 = vmatprep.mubr.msk.bf16.mxu0 %vm2524_vm2, %v2522_v1 }
 0x61f   : > { %2256 = vmatprep.subr.bf16.mxu0 %v2522_v1 }
 0x620   : > { %v2435_v25 = vpop.eup %2434 }
 0x621   : > { %v931_v26 = vmul.f32 %v2435_v25, %v2431_v13  ;;  %v2410_v13 = vld [vmem:[%s3004_s7 + $0x18] sm:$0xff]  }
 0x623   : > { %v932_v27 = vpack.c.bf16 %v931_v26, %v931_v26 }
 0x625   : > { %2247 = vmatmul.mubr.msk.bf16.vlgmr.msra.gmra.mxu0 %vm822_vm10, %v932_v27 }
 0x626   : > { %2258 = vmatprep.mubr.msk.bf16.mxu0 %vm2524_vm2, %v2522_v1  ;;  %2257 = vmatpush3.bf16.msra.mxu0 %v2406_v28 }
 0x627   : > { %2270 = vmatprep.subr.bf16.mxu0 %v2522_v1 }
 0x6dd   : > { %v864_v30 = vpop.f32.mrf.mxu0 }
 0x6de   : > { %v870_v31 = vpack.c.bf16 %v864_v30, %v864_v30 }
 0x6df   : > { %v2236_v32 = vpop.f32.mrf.mxu0 }
 0x6e0   : > { %2259 = vmatmul.mubr.msk.bf16.vlgmr.msra.gmra.mxu0 %vm760_vm7, %v870_v31 }
 0x6e1   : > { %v867_v33 = vpop.f32.mrf.mxu0  ;;  %2278 = vmatprep.mubr.msk.bf16.mxu0 %vm2524_vm2, %v2522_v1  ;;  %2271 = vmatpush3.bf16.msra.mxu0 %v2410_v13 }
 0x6e2   : > { %2272 = vmatprep.subr.bf16.mxu0 %v2522_v1 }
 0x6e3   : > { %v2237_v34 = vpop.f32.mrf.mxu0 }
 0x6e5   : > { %v975_v35 = vpop.f32.mrf.mxu0  ;;  %2273 = vmatpush3.bf16.msra.mxu0 %v2411_v14 }
 0x6e6   : > { %v981_v36 = vpack.c.bf16 %v975_v35, %v975_v35  ;;  %2274 = vmatprep.subr.bf16.mxu0 %v2522_v1  ;;  %v1262_v35 = vsub.s32 6, %v2695_v37 }
 0x6e7   : > { %v2248_v41 = vpop.f32.mrf.mxu0 }
 0x6e8   : > { %2253 = vmatmul.mubr.msk.bf16.vlgmr.msra.gmra.mxu1 %vm760_vm7, %v981_v36  ;;  %v1263_v36 = vrot.slane %v2703_v39, %v1262_v35  ;;  %v2414_v39 = vld [vmem:[%s3001_s4 + $0x18] sm:$0xff]  }
 0x6e9   : > { %v978_v42 = vpop.f32.mrf.mxu0  ;;  %2266 = vmatprep.mubr.msk.bf16.mxu1 %vm2524_vm2, %v2522_v1  ;;  %2263 = vmatpush3.bf16.msra.mxu1 %v2408_v63 }
 0x6ea   : > { %2264 = vmatprep.subr.bf16.mxu1 %v2522_v1  ;;  %2275 = vmatpush3.bf16.msra.mxu0 %v2412_v15 }
 0x6eb   : > { %v2249_v43 = vpop.f32.mrf.mxu0  ;;  %2276 = vmatprep.subr.bf16.mxu0 %v2522_v1 }
 0x6ee   : > { %2277 = vmatpush3.bf16.msra.mxu0 %v2413_v16 }
 0x6ef   : > { %2296 = vmatprep.subr.bf16.mxu0 %v2522_v1 }
 0x7a0   : > { %v1074_v44 = vpop.f32.mrf.mxu0 }
 0x7a2   : > { %v2260_v45 = vpop.f32.mrf.mxu0 }
 0x7a4   : > { %v1077_v46 = vpop.f32.mrf.mxu0 }
 0x7a6   : > { %v2261_v48 = vpop.f32.mrf.mxu0 }
 0x7a8   : > { %v1025_v49 = vpop.f32.mrf.mxu1 }
 0x7a9   : > { %v1075_v50 = vadd.f32 %v1074_v44, %v1025_v49 }
 0x7aa   : > { %v2254_v52 = vpop.f32.mrf.mxu1 }
 0x7ab   : > { %v1080_v53 = vadd.f32 %v1075_v50, %v2681_v24  ;;  %v2409_v24 = vld [vmem:[%s3003_s6] sm:$0xff]  }
 0x7ac   : > { %v1028_v54 = vpop.f32.mrf.mxu1  ;;  %2265 = vmatpush3.bf16.msra.mxu1 %v2409_v24 }
 0x7ad   : > { %v1085_v55 = vadd.f32 %v1084_v51, %v1080_v53  ;;  %2282 = vmatprep.subr.bf16.mxu1 %v2522_v1  ;;  %v2415_v54 = vld [vmem:[%s3001_s4 + $0x10] sm:$0xff]  }
 0x7ae   : > { %v2255_v56 = vpop.f32.mrf.mxu1 }
 0x7af   : > { %v1086_v57 = vsel %vm674_vm5, %v1085_v55, 0.0 }
 0x7b0   : > { %1087 = vadd.xlane.f32.xlu1 %v1086_v57 }
 0x839   : > { %v1088_v58 = vpop.xlane.xlu1 %1087 }
 0x83a   : > { %v1089_v59 = vmul.f32 0.03125, %v1088_v58  ;;  %v2830_v58 = vld [vmem:[%s3005_s8 + $0x8] sm:$0xff] }
 0x83c   : > { %v1090_v60 = vsub.f32 %v1085_v55, %v1089_v59  ;;  %v1293_v59 = vrot.slane %v2830_v58, %v2698_v38 }
 0x83e   : > { %v1091_v61 = vmul.f32 %v1090_v60, %v1090_v60 }
 0x840   : > { %v1092_v62 = vsel %vm674_vm5, %v1091_v61, 0.0 }
 0x841   : > { %1093 = vadd.xlane.f32.xlu0 %v1092_v62  ;;  %v1298_v62 = vrot.slane %v2830_v58, %v2706_v40 }
 0x8ca   : > { %v1094_v0 = vpop.xlane.xlu0 %1093 }
 0x8cb   : > { %v1095_v2 = vmul.f32 0.03125, %v1094_v0 }
 0x8cd   : > { %v1096_v3 = vadd.f32 1e-05, %v1095_v2 }
 0x8cf   : > { %2436 = vrsqrt.f32 %v1096_v3 }
 0x8dc   : > { %v2437_v7 = vpop.eup %2436 }
 0x8dd   : > { %v1098_v8 = vmul.f32 %v2437_v7, %v1090_v60 }
 0x8df   : > { %v1103_v10 = vmul.f32 %v1102_v6, %v1098_v8 }
 0x8e1   : > { %v1108_v11 = vadd.f32 %v1107_v9, %v1103_v10 }
 0x8e3   : > { %v1109_v12 = vpack.c.bf16 %v1108_v11, %v1108_v11 }
 0x8e5   : > { %2267 = vmatmul.mubr.msk.bf16.vlgmr.msra.gmra.mxu1 %vm712_vm6, %v1109_v12 }
 0x8e6   : > { %2286 = vmatprep.mubr.msk.bf16.mxu1 %vm2524_vm2, %v2522_v1  ;;  %2283 = vmatpush3.bf16.msra.mxu1 %v2414_v39 }
 0x8e7   : > { %2284 = vmatprep.subr.bf16.mxu1 %v2522_v1 }
 0x8ea   : > { %2285 = vmatpush3.bf16.msra.mxu1 %v2415_v54  ;;  %v2416_v54 = vld [vmem:[%s3002_s5 + $0x10] sm:$0xff]  }
 0x8eb   : > { %2290 = vmatprep.subr.bf16.mxu1 %v2522_v1 }
 0x9a5   : > { %v1167_v19 = vpop.f32.mrf.mxu1 }
 0x9a6   : > { %v1168_v20 = vadd.f32 %v1167_v19, %v1117_v18 }
 0x9a7   : > { %v2268_v21 = vpop.f32.mrf.mxu1 }
 0x9a8   : > { %v1173_v22 = vmul.f32 %v1168_v20, %v1168_v20 }
 0x9a9   : > { %v1170_v23 = vpop.f32.mrf.mxu1 }
 0x9aa   : > { %v1174_v25 = vmul.f32 %v1173_v22, %v1168_v20 }
 0x9ab   : > { %v2269_v26 = vpop.f32.mrf.mxu1 }
 0x9ac   : > { %v1175_v27 = vmul.f32 0.044715, %v1174_v25 }
 0x9ae   : > { %v1176_v28 = vadd.f32 %v1175_v27, %v1168_v20 }
 0x9b0   : > { %v1177_v29 = vmul.f32 0.7978846, %v1176_v28 }
 0x9b2   : > { %2438 = vtanh.f32 %v1177_v29 }
 0x9bf   : > { %v2439_v30 = vpop.eup %2438 }
 0x9c0   : > { %v1179_v31 = vadd.f32 1.0, %v2439_v30 }
 0x9c2   : > { %v1180_v32 = vmul.f32 0.5, %v1179_v31 }
 0x9c4   : > { %v1181_v33 = vmul.f32 %v1180_v32, %v1168_v20 }
 0x9c6   : > { %v1182_v34 = vpack.c.bf16 %v1181_v33, %v1181_v33 }
 0x9c8   : > { %2279 = vmatmul.mubr.msk.bf16.vlgmr.msra.gmra.mxu0 %vm1215_vm11, %v1182_v34 }
 0x9c9   : > { %2298 = vmatprep.mubr.msk.bf16.mxu0 %vm2524_vm2, %v2522_v1 }
 0xa88   : > { %v1253_v41 = vpop.f32.mrf.mxu0 }
 0xa89   : > { %v1259_v42 = vadd.f32 %v1253_v41, %v1108_v11 }
 0xa8a   : > { %v2280_v43 = vpop.f32.mrf.mxu0 }
 0xa8b   : > { %v2813_v44 = vadd.f32 %v1263_v36, %v1259_v42 }
 0xa8c   : > { %v1256_v45 = vpop.f32.mrf.mxu0 }
 0xa8d   : > { %v1277_v46 = vsel %vm674_vm5, %v2813_v44, 0.0 }
 0xa8e   : > { %1278 = vadd.xlane.f32.xlu1 %v1277_v46  ;;  %v2281_v48 = vpop.f32.mrf.mxu0 }
 0xb17   : > { %v1279_v49 = vpop.xlane.xlu1 %1278 }
 0xb18   : > { %v1280_v50 = vmul.f32 0.03125, %v1279_v49 }
 0xb1a   : > { %v1281_v51 = vsub.f32 %v2813_v44, %v1280_v50 }
 0xb1c   : > { %v1282_v52 = vmul.f32 %v1281_v51, %v1281_v51 }
 0xb1e   : > { %v1283_v53 = vsel %vm674_vm5, %v1282_v52, 0.0 }
 0xb1f   : > { %1284 = vadd.xlane.f32.xlu1 %v1283_v53 }
 0xba8   : > { %v1285_v55 = vpop.xlane.xlu1 %1284 }
 0xba9   : > { %v1286_v56 = vmul.f32 0.03125, %v1285_v55  ;;  %v2417_v55 = vld [vmem:[%s3002_s5 + $0x18] sm:$0xff]  }
 0xbab   : > { %v1287_v57 = vadd.f32 1e-05, %v1286_v56 }
 0xbad   : > { %2440 = vrsqrt.f32 %v1287_v57 }
 0xbba   : > { %v2441_v60 = vpop.eup %2440 }
 0xbbb   : > { %v1289_v61 = vmul.f32 %v2441_v60, %v1281_v51 }
 0xbbd   : > { %v1294_v63 = vmul.f32 %v1293_v59, %v1289_v61 }
 0xbbf   : > { %v1299_v24 = vadd.f32 %v1298_v62, %v1294_v63 }
 0xbc1   : > { %v1300_v0 = vpack.c.bf16 %v1299_v24, %v1299_v24 }
 0xbc3   : > { %2287 = vmatmul.mubr.msk.bf16.vlgmr.msra.gmra.mxu1 %vm712_vm6, %v1300_v0 }
 0xbc4   : > { %2292 = vmatprep.mubr.msk.bf16.mxu1 %vm2524_vm2, %v2522_v1 }
 0xc83   : > { %v1350_v2 = vpop.f32.mrf.mxu1 }
 0xc84   : > { %v1356_v3 = vpack.c.bf16 %v1350_v2, %v1350_v2 }
 0xc85   : > { %v2288_v6 = vpop.f32.mrf.mxu1 }
 0xc86   : > { %1469 = vrot.lane.b32.xlu0 %v1356_v3, %s2527_s13  ;;  %1358 = vrot.lane.b32.xlu1 %v1356_v3, %s2526_s12  ;;  %s3016_s12 = smov 48   ;;  %s2460_s13 = scalar_lea.vmem %s2958_s16, 16 }
 0xc87   : > { %v1353_v7 = vpop.f32.mrf.mxu1  ;;  %p2461_p11 = scmp.ne.s32.totalorder %s2958_s16, %s2460_s13  ;;  %p2468_p1 = scmp.lt.s32.totalorder %s2466_s22, %s2460_s13 }
 0xc89   : > { %v2289_v8 = vpop.f32.mrf.mxu1  ;;  %p2462_p12 = pnand %p2461_p11, %p2630_p5  ;;  %p2469_p2 = por %p2468_p1, %p2467_p0 }
 0xc8a   : > { %1467 = vrot.lane.b32.xlu1 %v1356_v3, %s2525_s30  ;;  %s3015_s30 = smov 64  }
 0xc8b   : > { %p2463_p13 = pneg %p2462_p12 }
 0xc8d   : > { %p2470_p3 = pnand %p2469_p2, %p2463_p13 }
 0xcf8   : > { %v1359_v9 = vpop.permute.xlu1 %1358  ;;  %v1470_v11 = vpop.permute.xlu0 %1469 }
 0xcf9   : > { %v1364_v10 = vsel %vm760_vm7, %v1359_v9, 0  ;;  %v1475_v12 = vsel %vm760_vm7, %v1470_v11, 0  ;;  %v1680_v11 = vrot.slane %v2830_v58, %v2759_v47 }
 0xcfa   : > { %2291 = vmatpush3.bf16.xpose.msra.mxu1 %v1364_v10 }
 0xcfb   : > { %2302 = vmatprep.subr.bf16.mxu1 %v2522_v1 }
 0xcfc   : > { %v1468_v13 = vpop.permute.xlu1 %1467 }
 0xd01   : > { %2293 = vmatmul.mubr.msk.bf16.vlgmr.msra.gmra.mxu1 %vm760_vm7, %v1356_v3 }
 0xd02   : > { %2303 = vmatpush3.bf16.xpose.msra.mxu1 %v1475_v12  ;;  %2304 = vmatprep.mubr.msk.bf16.mxu1 %vm2524_vm2, %v2522_v1 }
 0xd03   : > { %2314 = vmatprep.subr.bf16.mxu1 %v2522_v1 }
 0xd09   : > { %2305 = vmatmul.mubr.msk.bf16.vlgmr.msra.gmra.mxu1 %vm760_vm7, %v1468_v13 }
 0xd0a   : > { %2316 = vmatprep.mubr.msk.bf16.mxu1 %vm2524_vm2, %v2522_v1  ;;  %2315 = vmatpush3.bf16.msra.mxu1 %v2417_v55 }
 0xd0b   : > { %2326 = vmatprep.subr.bf16.mxu1 %v2522_v1 }
 0xdc1   : > { %v1400_v14 = vpop.f32.mrf.mxu1 }
 0xdc2   : > { %v1406_v15 = vsel %vm807_vm8, %v1400_v14, -inf }
 0xdc3   : > { %1407 = vmax.xlane.f32.xlu1 %v1406_v15  ;;  %v2294_v16 = vpop.f32.mrf.mxu1 }
 0xdc5   : > { %v1403_v18 = vpop.f32.mrf.mxu1 }
 0xdc7   : > { %v2295_v19 = vpop.f32.mrf.mxu1 }
 0xdc9   : > { %v1511_v20 = vpop.f32.mrf.mxu1 }
 0xdca   : > { %v1517_v21 = vsel %vm807_vm8, %v1511_v20, -inf }
 0xdcb   : > { %1518 = vmax.xlane.f32.xlu0 %v1517_v21  ;;  %v2306_v22 = vpop.f32.mrf.mxu1 }
 0xdcd   : > { %v1514_v23 = vpop.f32.mrf.mxu1 }
 0xdcf   : > { %v2307_v25 = vpop.f32.mrf.mxu1 }
 0xdd0   : > { %v2418_v25 = vld [vmem:[%s3003_s6 + $0x18] sm:$0xff]  }
 0xe4c   : > { %v1408_v26 = vpop.xlane.xlu1 %1407 }
 0xe4d   : > { %v1409_v27 = vsub.f32 %v1400_v14, %v1408_v26 }
 0xe4f   : > { %v1410_v28 = vmul.f32 1.442695, %v1409_v27 }
 0xe51   : > { %2442 = vpow2.f32 %v1410_v28 }
 0xe54   : > { %v1519_v29 = vpop.xlane.xlu0 %1518 }
 0xe55   : > { %v1520_v30 = vsub.f32 %v1511_v20, %v1519_v29  ;;  %v1698_v29 = vrot.slane %v2830_v58, %v2775_v4 }
 0xe57   : > { %v1521_v31 = vmul.f32 1.442695, %v1520_v30 }
 0xe59   : > { %2444 = vpow2.f32 %v1521_v31 }
 0xe5e   : > { %v2443_v32 = vpop.eup %2442 }
 0xe5f   : > { %v1412_v33 = vsel %vm807_vm8, %v2443_v32, 0.0 }
 0xe60   : > { %1413 = vadd.xlane.f32.xlu0 %v1412_v33 }
 0xe66   : > { %v2445_v34 = vpop.eup %2444 }
 0xe67   : > { %v1523_v36 = vsel %vm807_vm8, %v2445_v34, 0.0 }
 0xe68   : > { %1524 = vadd.xlane.f32.xlu1 %v1523_v36 }
 0xe76   : > { %1418 = vrot.lane.b32.xlu0 %v1356_v3, %s3015_s30  ;;  %s2956_s30 = scalar_lea.hbm %s3008_s11, %s2137_s15 }
 0xe79   : > { %1529 = vrot.lane.b32.xlu1 %v1356_v3, %s3016_s12  ;;  %s1997_s12 = scalar_lea.sflag [#allocation3], %s375_s14 }
 0xee9   : > { %v1414_v41 = vpop.xlane.xlu0 %1413 }
 0xeea   : > { %2446 = vrcp.f32 %v1414_v41  ;;  %v2420_v41 = vld [vmem:[%s3004_s7 + $0x38] sm:$0xff]  }
 0xeed   : > { %v1419_v42 = vpop.permute.xlu0 %1418 }
 0xeee   : > { %v1424_v43 = vsel %vm826_vm9, %v1419_v42, 0  ;;  %v2421_v42 = vld [vmem:[%s3004_s7 + $0x30] sm:$0xff]  }
 0xeef   : > { %2297 = vmatpush3.bf16.msra.mxu0 %v1424_v43  ;;  %v2423_v43 = vld [vmem:[%s3004_s7 + $0x20] sm:$0xff]  }
 0xef0   : > { %2308 = vmatprep.subr.bf16.mxu0 %v2522_v1 }
 0xef1   : > { %v1525_v45 = vpop.xlane.xlu1 %1524 }
 0xef2   : > { %2448 = vrcp.f32 %v1525_v45  ;;  %v1714_v45 = vrot.slane %v2830_v58, %v1116_v17  ;;  %v1860_v17 = vrot.slane %v2830_v58, %v1262_v35  ;;  %v2930_v35 = vld [vmem:[%s3006_s9] sm:$0xff] }
 0xef5   : > { %v1530_v49 = vpop.permute.xlu1 %1529 }
 0xef6   : > { %v1535_v51 = vsel %vm826_vm9, %v1530_v49, 0 }
 0xef7   : > { %v2447_v46 = vpop.eup %2446 }
 0xef8   : > { %v1416_v48 = vmul.f32 %v2447_v46, %v2443_v32  ;;  %v1703_v32 = vrot.slane %v2830_v58, %v1106_v5  ;;  %v2422_v5 = vld [vmem:[%s3004_s7 + $0x28] sm:$0xff]   ;;  %v1879_v58 = vrot.slane %v2930_v35, %v2698_v38  ;;  %v1897_v38 = vrot.slane %v2930_v35, %v2775_v4 }
 0xefa   : > { %v1417_v50 = vpack.c.bf16 %v1416_v48, %v1416_v48 }
 0xefc   : > { %2299 = vmatmul.mubr.msk.bf16.vlgmr.msra.gmra.mxu0 %vm822_vm10, %v1417_v50 }
 0xefd   : > { %2309 = vmatpush3.bf16.msra.mxu0 %v1535_v51  ;;  %2310 = vmatprep.mubr.msk.bf16.mxu0 %vm2524_vm2, %v2522_v1 }
 0xefe   : > { %2320 = vmatprep.subr.bf16.mxu0 %v2522_v1 }
 0xeff   : > { %v2449_v52 = vpop.eup %2448 }
 0xf00   : > { %v1527_v53 = vmul.f32 %v2449_v52, %v2445_v34 }
 0xf02   : > { %v1528_v39 = vpack.c.bf16 %v1527_v53, %v1527_v53 }
 0xf04   : > { %2311 = vmatmul.mubr.msk.bf16.vlgmr.msra.gmra.mxu0 %vm822_vm10, %v1528_v39 }
 0xf05   : > { %2322 = vmatprep.mubr.msk.bf16.mxu0 %vm2524_vm2, %v2522_v1  ;;  %2321 = vmatpush3.bf16.msra.mxu0 %v2416_v54 }
 0xf06   : > { %2334 = vmatprep.subr.bf16.mxu0 %v2522_v1 }
 0xfbc   : > { %v1460_v56 = vpop.f32.mrf.mxu0 }
 0xfbd   : > { %v1466_v57 = vpack.c.bf16 %v1460_v56, %v1460_v56 }
 0xfbe   : > { %v2300_v59 = vpop.f32.mrf.mxu0 }
 0xfbf   : > { %2323 = vmatmul.mubr.msk.bf16.vlgmr.msra.gmra.mxu0 %vm760_vm7, %v1466_v57 }
 0xfc0   : > { %v1463_v60 = vpop.f32.mrf.mxu0  ;;  %2342 = vmatprep.mubr.msk.bf16.mxu0 %vm2524_vm2, %v2522_v1  ;;  %2335 = vmatpush3.bf16.msra.mxu0 %v2420_v41 }
 0xfc1   : > { %2336 = vmatprep.subr.bf16.mxu0 %v2522_v1 }
 0xfc2   : > { %v2301_v61 = vpop.f32.mrf.mxu0 }
 0xfc4   : > { %v1571_v62 = vpop.f32.mrf.mxu0  ;;  %2337 = vmatpush3.bf16.msra.mxu0 %v2421_v42 }
 0xfc5   : > { %v1577_v63 = vpack.c.bf16 %v1571_v62, %v1571_v62  ;;  %2338 = vmatprep.subr.bf16.mxu0 %v2522_v1 }
 0xfc6   : > { %v2312_v24 = vpop.f32.mrf.mxu0 }
 0xfc7   : > { %2317 = vmatmul.mubr.msk.bf16.vlgmr.msra.gmra.mxu1 %vm760_vm7, %v1577_v63 }
 0xfc8   : > { %v1574_v0 = vpop.f32.mrf.mxu0  ;;  %2330 = vmatprep.mubr.msk.bf16.mxu1 %vm2524_vm2, %v2522_v1  ;;  %2327 = vmatpush3.bf16.msra.mxu1 %v2418_v25 }
 0xfc9   : > { %2328 = vmatprep.subr.bf16.mxu1 %v2522_v1  ;;  %2339 = vmatpush3.bf16.msra.mxu0 %v2422_v5 }
 0xfca   : > { %v2313_v2 = vpop.f32.mrf.mxu0  ;;  %2340 = vmatprep.subr.bf16.mxu0 %v2522_v1 }
 0xfcd   : > { %2341 = vmatpush3.bf16.msra.mxu0 %v2423_v43 }
0x107f   : > { %v1670_v3 = vpop.f32.mrf.mxu0 }
0x1081   : > { %v2324_v6 = vpop.f32.mrf.mxu0 }
0x1083   : > { %v1673_v7 = vpop.f32.mrf.mxu0 }
0x1085   : > { %v2325_v8 = vpop.f32.mrf.mxu0 }
0x1087   : > { %v1621_v9 = vpop.f32.mrf.mxu1 }
0x1088   : > { %v1671_v10 = vadd.f32 %v1670_v3, %v1621_v9 }
0x1089   : > { %v2318_v12 = vpop.f32.mrf.mxu1 }
0x108a   : > { %v1676_v13 = vadd.f32 %v1671_v10, %v2813_v44  ;;  %v2419_v44 = vld [vmem:[%s3003_s6 + $0x10] sm:$0xff]  }
0x108b   : > { %v1624_v14 = vpop.f32.mrf.mxu1  ;;  %2329 = vmatpush3.bf16.msra.mxu1 %v2419_v44 }
0x108c   : > { %v1681_v15 = vadd.f32 %v1680_v11, %v1676_v13  ;;  %2346 = vmatprep.subr.bf16.mxu1 %v2522_v1 }
0x108d   : > { %v2319_v16 = vpop.f32.mrf.mxu1 }
0x108e   : > { %v1682_v18 = vsel %vm674_vm5, %v1681_v15, 0.0  ;;  %v1884_v16 = vrot.slane %v2930_v35, %v2706_v40 }
0x108f   : > { %1683 = vadd.xlane.f32.xlu1 %v1682_v18 }
0x1118   : > { %v1684_v19 = vpop.xlane.xlu1 %1683 }
0x1119   : > { %v1685_v20 = vmul.f32 0.03125, %v1684_v19  ;;  %v1889_v19 = vrot.slane %v2930_v35, %v2759_v47 }
0x111b   : > { %v1686_v21 = vsub.f32 %v1681_v15, %v1685_v20 }
0x111d   : > { %v1687_v22 = vmul.f32 %v1686_v21, %v1686_v21 }
0x111f   : > { %v1688_v23 = vsel %vm674_vm5, %v1687_v22, 0.0 }
0x1120   : > { %1689 = vadd.xlane.f32.xlu0 %v1688_v23  ;;  %v2530_v23 = vmov 0  }
0x1121   : > { %2402 = vset.pattern.permute.xlu1 %v2530_v23  ;;  %2403 = vset.pattern.permute.xlu0 %v2530_v23 }
0x11a9   : > { %v1690_v26 = vpop.xlane.xlu0 %1689 }
0x11aa   : > { %v1691_v27 = vmul.f32 0.03125, %v1690_v26 }
0x11ac   : > { %v1692_v28 = vadd.f32 1e-05, %v1691_v27 }
0x11ae   : > { %2450 = vrsqrt.f32 %v1692_v28 }
0x11bb   : > { %v2451_v30 = vpop.eup %2450 }
0x11bc   : > { %v1694_v31 = vmul.f32 %v2451_v30, %v1686_v21 }
0x11be   : > { %v1699_v33 = vmul.f32 %v1698_v29, %v1694_v31 }
0x11c0   : > { %v1704_v34 = vadd.f32 %v1703_v32, %v1699_v33 }
0x11c2   : > { %v1705_v36 = vpack.c.bf16 %v1704_v34, %v1704_v34 }
0x11c4   : > { %2331 = vmatmul.mubr.msk.bf16.vlgmr.msra.gmra.mxu1 %vm712_vm6, %v1705_v36 }
0x11c5   : > { %2350 = vmatprep.mubr.msk.bf16.mxu1 %vm2524_vm2, %v2522_v1 }
0x1284   : > { %v1764_v46 = vpop.f32.mrf.mxu1 }
0x1285   : > { %v1765_v48 = vadd.f32 %v1764_v46, %v1714_v45 }
0x1286   : > { %v2332_v49 = vpop.f32.mrf.mxu1 }
0x1287   : > { %v1770_v50 = vmul.f32 %v1765_v48, %v1765_v48  ;;  %v2425_v49 = vld [vmem:[%s3007_s10] sm:$0xff]  }
0x1288   : > { %v1767_v51 = vpop.f32.mrf.mxu1 }
0x1289   : > { %v1771_v52 = vmul.f32 %v1770_v50, %v1765_v48 }
0x128a   : > { %v2333_v53 = vpop.f32.mrf.mxu1 }
0x128b   : > { %v1772_v39 = vmul.f32 0.044715, %v1771_v52 }
0x128d   : > { %v1773_v54 = vadd.f32 %v1772_v39, %v1765_v48 }
0x128f   : > { %v1774_v55 = vmul.f32 0.7978846, %v1773_v54 }
0x1291   : > { %2452 = vtanh.f32 %v1774_v55 }
0x129e   : > { %v2453_v56 = vpop.eup %2452 }
0x129f   : > { %v1776_v57 = vadd.f32 1.0, %v2453_v56 }
0x12a1   : > { %v1777_v59 = vmul.f32 0.5, %v1776_v57 }
0x12a3   : > { %v1778_v60 = vmul.f32 %v1777_v59, %v1765_v48  ;;  %v2424_v48 = vld [vmem:[%s3007_s10 + $0x8] sm:$0xff]  }
0x12a4   : > { %2347 = vmatpush3.bf16.msra.mxu1 %v2424_v48 }
0x12a5   : > { %v1779_v61 = vpack.c.bf16 %v1778_v60, %v1778_v60  ;;  %2348 = vmatprep.subr.bf16.mxu1 %v2522_v1  ;;  %v1950_v1 = vrot.slane %v2930_v35, 4 }
0x12a7   : > { %2343 = vmatmul.mubr.msk.bf16.vlgmr.msra.gmra.mxu0 %vm1215_vm11, %v1779_v61 }
0x12a8   : > { %2349 = vmatpush3.bf16.msra.mxu1 %v2425_v49 }
0x1367   : > { %v1850_v62 = vpop.f32.mrf.mxu0 }
0x1368   : > { %v1856_v63 = vadd.f32 %v1850_v62, %v1704_v34 }
0x1369   : > { %v2344_v24 = vpop.f32.mrf.mxu0 }
0x136a   : > { %v1861_v0 = vadd.f32 %v1860_v17, %v1856_v63 }
0x136b   : > { %v1853_v2 = vpop.f32.mrf.mxu0 }
0x136c   : > { %v1863_v3 = vsel %vm674_vm5, %v1861_v0, 0.0 }
0x136d   : > { %1864 = vadd.xlane.f32.xlu0 %v1863_v3  ;;  %v2345_v6 = vpop.f32.mrf.mxu0 }
0x13f6   : > { %v1865_v7 = vpop.xlane.xlu0 %1864 }
0x13f7   : > { %v1866_v8 = vmul.f32 0.03125, %v1865_v7 }
0x13f9   : > { %v1867_v9 = vsub.f32 %v1861_v0, %v1866_v8 }
0x13fb   : > { %v1868_v10 = vmul.f32 %v1867_v9, %v1867_v9 }
0x13fd   : > { %v1869_v11 = vsel %vm674_vm5, %v1868_v10, 0.0 }
0x13fe   : > { %1870 = vadd.xlane.f32.xlu1 %v1869_v11 }
0x1487   : > { %v1871_v12 = vpop.xlane.xlu1 %1870 }
0x1488   : > { %v1872_v37 = vmul.f32 0.03125, %v1871_v12 }
0x148a   : > { %v1873_v13 = vadd.f32 1e-05, %v1872_v37 }
0x148c   : > { %2454 = vrsqrt.f32 %v1873_v13 }
0x1499   : > { %v2455_v14 = vpop.eup %2454 }
0x149a   : > { %v1875_v15 = vmul.f32 %v2455_v14, %v1867_v9 }
0x149c   : > { %v1880_v18 = vmul.f32 %v1879_v58, %v1875_v15 }
0x149e   : > { %v1885_v20 = vadd.f32 %v1884_v16, %v1880_v18 }
0x14a0   : > { %v1890_v21 = vmul.f32 %v1889_v19, %v1885_v20 }
0x14a2   : > { %v1891_v22 = vsel %vm674_vm5, %v1890_v21, 0.0 }
0x14a3   : > { %1892 = vadd.xlane.f32.xlu0 %v1891_v22 }
0x152c   : > { %v1893_v25 = vpop.xlane.xlu0 %1892 }
0x152d   : > { %v1898_v44 = vadd.f32 %v1897_v38, %v1893_v25 }
0x152f   : > { %v1900_v26 = vsel %vm1899_vm12, %v1898_v44, -inf }
0x1530   : > { %v1901_v40 = vrot.slane %v1900_v26, 4 }
0x1532   : > { %v1902_v27 = vmax.f32 %v1900_v26, %v1901_v40 }
0x1534   : > { %v1903_v28 = vrot.slane %v1902_v27, 2 }
0x1536   : > { %v1904_v29 = vmax.f32 %v1902_v27, %v1903_v28 }
0x1538   : > { %v1905_v47 = vrot.slane %v1904_v29, 1 }
0x153a   : > { %v1906_v30 = vmax.f32 %v1904_v29, %v1905_v47 }
0x153c   : > { %v1907_v31 = vsub.f32 %v1898_v44, %v1906_v30 }
0x153e   : > { %v1908_v32 = vmul.f32 1.442695, %v1907_v31 }
0x1540   : > { %2456 = vpow2.f32 %v1908_v32 }
0x154d   : > { %v2457_v33 = vpop.eup %2456 }
0x154e   : > { %v1910_v34 = vsel %vm1899_vm12, %v2457_v33, 0.0 }
0x154f   : > { %v1911_v36 = vrot.slane %v1910_v34, 4 }
0x1551   : > { %v1912_v41 = vadd.f32 %v1911_v36, %v1910_v34 }
0x1553   : > { %v1913_v42 = vrot.slane %v1912_v41, 2 }
0x1555   : > { %v1914_v5 = vadd.f32 %v1913_v42, %v1912_v41 }
0x1557   : > { %v1915_v4 = vrot.slane %v1914_v5, 1 }
0x1559   : > { %v1916_v43 = vadd.f32 %v1915_v4, %v1914_v5 }
0x155b   : > { %2458 = vrcp.f32 %v1916_v43 }
0x1568   : > { %v2459_v45 = vpop.eup %2458 }
0x1569   : > { %v1918_v46 = vmul.f32 %v2459_v45, %v2457_v33 }
0x156b   : > { %1921 = vperm.xlu1 %2402, %v1918_v46  }
0x15e6   : > { %v1922_v50 = vpop.permute.xlu1 %1921 }
0x15e7   : > { %v1924_v51 = vmul.f32 %v1922_v50, %v1885_v20 }
0x15e9   : > { %v1925_v52 = vsel %vm674_vm5, %v1924_v51, 0.0 }
0x15ea   : > { %v1926_v53 = vrot.slane %v1925_v52, 4 }
0x15ec   : > { %v1927_v39 = vadd.f32 %v1926_v53, %v1925_v52 }
0x15ee   : > { %v1928_v54 = vrot.slane %v1927_v39, 2 }
0x15f0   : > { %v1929_v55 = vadd.f32 %v1928_v54, %v1927_v39 }
0x15f2   : > { %v1930_v56 = vrot.slane %v1929_v55, 1 }
0x15f4   : > { %v1931_v57 = vadd.f32 %v1930_v56, %v1929_v55 }
0x15f6   : > { %v1932_v59 = vpack.c.bf16 %v1931_v57, %v1931_v57 }
0x15f8   : > { %2351 = vmatmul.mubr.msk.bf16.vlgmr.msra.gmra.mxu1 %vm712_vm6, %v1932_v59 }
0x16b8   : > { %v1989_v60 = vpop.f32.mrf.mxu1 }
0x16b9   : > { %v1990_v61 = vadd.f32 %v1989_v60, %v1950_v1 }
0x16ba   : > { %v2352_v17 = vpop.f32.mrf.mxu1 }
0x16bb   : > { %1995 = vst [vmem:[%s376_s29] sm:$0x1] %v1990_v61 }
0x16bc   : > { %v1992_v62 = vpop.f32.mrf.mxu1 }
0x16bd   : > { %2473 = shalt.err (!%p2470_p3)
}
0x16be   : > { %s2474_s15 = scalar_lea.hbm %s2956_s30, 16  ;;  %s2478_s24 = scalar_lea.hbm %s3008_s11, 32 }
0x16bf   : > { %p2475_p4 = scmp.ne.s32.totalorder %s2956_s30, %s2474_s15  ;;  %p2479_p9 = scmp.lt.s32.totalorder %s2956_s30, %s3008_s11 }
0x16c0   : > { %p2480_p10 = scmp.lt.s32.totalorder %s2478_s24, %s2474_s15 }
0x16c1   : > { %p2476_p7 = pnand %p2475_p4, %p2630_p5 }
0x16c2   : > { %p2481_p11 = por %p2480_p10, %p2479_p9 }
0x16c3   : > { %p2477_p8 = pneg %p2476_p7 }
0x16c5   : > { %p2482_p12 = pnand %p2481_p11, %p2477_p8 }
0x16c7   : > { %2485 = shalt.err (!%p2482_p12)
}
0x16c8   : > { %2354 = dma.vmem_to_hbm [thread:$0]  (%p2630_p5), %s2958_s16, 16, %s2956_s30, %s1997_s12   ;;  %v2353_v63 = vpop.f32.mrf.mxu1 }
0x16c9 PF: > { %p2360_p13 = scmp.ge.s32.totalorder %s2520_s20, 2  ;;  %s2021_s13 = sand.u32 1, %s2508_s17  }
0x16ca   : > { %s2022_s0 = scalar_lea.sflag [#allocation3], %s2021_s13 }
0x16cb   : > { %p2357_p0 = pnand %p2360_p13, %p2634_p6 }
0x16cd   : > { %p2358_p1 = pneg %p2357_p0 }
0x16cf   : > { %2503 = dma.done.wait (%p2358_p1), %s2022_s0, 16  }
0x16d0   : > { %2505 = vsyncadd (%p2358_p1), %s2022_s0, 4294967280  ;;  %p21_p2 = scmp.ge.s32.totalorder %s2617_s23, 4   ;;  %s3017_s17 = smov %s2512_s18 }
0x16d1   : > { %s3018_s18 = smov %s2516_s19  ;;  %s3019_s19 = smov %s2628_s26 }
0x16d2   : > { %s3020_s20 = smov %s2617_s23  ;;  %23 = sbr.rel (!%p21_p2) target bundleno = 5 (0x5), region = 106 }
0x16d7   :  { %2026 = vsyncpa [#allocation3], 1 }
0x16d8   :  { %2028 = vsyncpa [#allocation3 + $0x1], 1 }

</bundles_post_ra>
